<compile_context>
chip_gen: v6e
topology: v6e:2x2x1
jax: 0.10.0
libtpu: 0.0.40
codegen_flags: <defaults>
</compile_context>

<pallas_src>
import jax
import jax.numpy as jnp
from jax.experimental import pallas as pl
from jax.experimental.pallas import tpu as pltpu


# ---------------------------------------------------------------------------
# Fused kernel: per selected candidate, global max-pool its feature map and
# copy its mask row.  grid = (B * K_selected,), one candidate per step.
# ---------------------------------------------------------------------------
def _fused_pool_gather_kernel(idx_ref, feat_ref, mask_ref,
                              feat_out_ref, mask_out_ref):
    # idx_ref:       SMEM (Q,) flat row indices (consumed by the index_maps)
    # feat_ref:      VMEM (1, C, S)  selected candidate feature map (bf16)
    # mask_ref:      VMEM (1, 1, HW) selected candidate mask row
    # feat_out_ref:  VMEM (1, 1, C)  pooled feature output block (f32)
    # mask_out_ref:  VMEM (1, 1, HW) mask output block
    del idx_ref  # only used by the index_maps
    pooled = jnp.max(feat_ref[...], axis=-1)            # (1, C), lane-dense
    feat_out_ref[0] = pooled.astype(feat_out_ref.dtype)
    mask_out_ref[...] = mask_ref[...]                    # lane-dense row copy


def _fused_pool_gather(features_rows, masks_rows, flat_idx):
    """features_rows: (M, C, S); masks_rows: (M, 1, HW); flat_idx: (Q,) int32.

    Returns (pooled_features (Q, 1, C) float32, gathered_masks (Q, 1, HW))."""
    M, C, S = features_rows.shape
    _, _, HW = masks_rows.shape
    Q = flat_idx.shape[0]
    return pl.pallas_call(
        _fused_pool_gather_kernel,
        out_shape=(jax.ShapeDtypeStruct((Q, 1, C), jnp.float32),
                   jax.ShapeDtypeStruct((Q, 1, HW), masks_rows.dtype)),
        grid_spec=pltpu.PrefetchScalarGridSpec(
            num_scalar_prefetch=1,
            grid=(Q,),
            in_specs=[
                # Data-dependent gather of only the selected feature maps.
                pl.BlockSpec((1, C, S), lambda i, idx: (idx[i], 0, 0)),
                # Data-dependent gather of only the selected mask rows.
                pl.BlockSpec((1, 1, HW), lambda i, idx: (idx[i], 0, 0)),
            ],
            out_specs=[
                pl.BlockSpec((1, 1, C), lambda i, idx: (i, 0, 0)),
                pl.BlockSpec((1, 1, HW), lambda i, idx: (i, 0, 0)),
            ]),
        compiler_params=pltpu.CompilerParams(
            dimension_semantics=("parallel",),
            vmem_limit_bytes=32 * 1024 * 1024),
    )(flat_idx, features_rows, masks_rows)


# ---------------------------------------------------------------------------
# Forward pass glue (mirrors embed_segmentation_results + merge_list)
# ---------------------------------------------------------------------------
def sam_embedder_forward(masks, features, areas, bboxs, scores, num_queries):
    """
    masks:    (B, N, H, W)       binary masks (bf16; exact for 0/1)
    features: (B, N, C, Hf, Wf)  candidate segmentation features (bf16 from fp16 SAM)
    areas:    (B, N)             int32
    bboxs:    (B, N, 4)          int32
    scores:   (B, N)             float32 stability scores
    returns dict with (B, num_queries, ...) tensors (same keys as the module).
    """
    B, N, C, Hf, Wf = features.shape
    H, W = masks.shape[-2:]
    K = num_queries
    S = Hf * Wf
    HW = H * W

    feat_rows = features.reshape(B * N, C, S)
    mask_rows = masks.reshape(B * N, 1, HW)

    if N > K:
        # sorted(outputs, key=stability_score, reverse=True)[:num_queries]
        # NOTE: ties may be ordered differently than a stable Python sort.
        top_scores, topk_idx = jax.lax.top_k(scores, K)
        topk_idx = topk_idx.astype(jnp.int32)
        sel_scores = top_scores
        sel_areas = jnp.take_along_axis(areas, topk_idx, axis=1)
        sel_bboxs = jnp.take_along_axis(bboxs, topk_idx[:, :, None], axis=1)
        ksel = K
    else:
        # len(outputs) <= num_queries: keep original candidate order, pad later
        # (the reference module only sorts when len > num_queries).
        topk_idx = jnp.broadcast_to(jnp.arange(N, dtype=jnp.int32), (B, N))
        sel_scores, sel_areas, sel_bboxs = scores, areas, bboxs
        ksel = N

    flat_idx = (topk_idx + (jnp.arange(B, dtype=jnp.int32) * N)[:, None]).reshape(-1)

    # Fused Pallas kernel: pool + gather ONLY the selected candidates.
    pooled_sel, masks_sel = _fused_pool_gather(feat_rows, mask_rows, flat_idx)
    sel_feats = pooled_sel.reshape(B, ksel, C)
    sel_masks = masks_sel.reshape(B, ksel, H, W)

    if ksel < K:
        pad = K - ksel
        sel_masks = jnp.pad(sel_masks, ((0, 0), (0, pad), (0, 0), (0, 0)))
        sel_feats = jnp.pad(sel_feats, ((0, 0), (0, pad), (0, 0)))
        sel_areas = jnp.pad(sel_areas, ((0, 0), (0, pad)))
        sel_bboxs = jnp.pad(sel_bboxs, ((0, 0), (0, pad), (0, 0)))
        sel_scores = jnp.pad(sel_scores, ((0, 0), (0, pad)))

    return {
        "segmentation_masks": sel_masks,
        "segmentation_features": sel_feats,
        "segmentation_areas": sel_areas,
        "segmentation_bboxs": sel_bboxs,
        "segmentation_stability_scores": sel_scores,
    }


if __name__ == "__main__":
    # Small, deterministic synthetic "SAM mask-generator outputs".
    B = 2            # batch of rgb_uint8 images
    N = 8            # candidate segments per image (from the mask generator)
    NUM_QUERIES = 5  # config['model']['num_queries']
    H = W = 32       # mask spatial size (small stand-in for 224x224)
    C = 128          # feature channels (small stand-in for 256)
    Hf = Wf = 64     # feature-map spatial size; pool kernel is (64, 64) -> global

    key = jax.random.PRNGKey(0)
    k1, k2, k3, k4, k5 = jax.random.split(key, 5)
    # Masks are binary -> bf16 transport is exact (int8 would also work).
    masks = (jax.random.uniform(k1, (B, N, H, W)) > 0.5).astype(jnp.bfloat16)
    # SAM runs under fp16 autocast -> features arrive half precision.
    features = jax.random.normal(k2, (B, N, C, Hf, Wf)).astype(jnp.bfloat16)
    areas = jax.random.randint(k3, (B, N), 1, 1000, dtype=jnp.int32)
    bboxs = jax.random.randint(k4, (B, N, 4), 0, 224, dtype=jnp.int32)
    scores = jax.random.uniform(k5, (B, N), dtype=jnp.float32)

    # --- Path 1: N > num_queries (sort + select top-k) ----------------------
    out = sam_embedder_forward(masks, features, areas, bboxs, scores, NUM_QUERIES)
    out = jax.tree_util.tree_map(jax.block_until_ready, out)

    ref_pooled = jnp.max(features, axis=(-2, -1)).astype(jnp.float32)   # (B, N, C)
    ref_scores, ref_idx = jax.lax.top_k(scores, NUM_QUERIES)
    ref_feats = jnp.take_along_axis(ref_pooled, ref_idx[:, :, None], axis=1)
    ref_masks = jnp.take_along_axis(masks, ref_idx[:, :, None, None], axis=1)
    ref_areas = jnp.take_along_axis(areas, ref_idx, axis=1)
    ref_bboxs = jnp.take_along_axis(bboxs, ref_idx[:, :, None], axis=1)

    assert out["segmentation_masks"].shape == (B, NUM_QUERIES, H, W)
    assert out["segmentation_features"].shape == (B, NUM_QUERIES, C)
    assert out["segmentation_areas"].shape == (B, NUM_QUERIES)
    assert out["segmentation_bboxs"].shape == (B, NUM_QUERIES, 4)
    assert out["segmentation_stability_scores"].shape == (B, NUM_QUERIES)
    assert jnp.allclose(out["segmentation_features"], ref_feats)
    assert jnp.allclose(out["segmentation_masks"].astype(jnp.float32),
                        ref_masks.astype(jnp.float32))
    assert jnp.all(out["segmentation_areas"] == ref_areas)
    assert jnp.all(out["segmentation_bboxs"] == ref_bboxs)
    assert jnp.allclose(out["segmentation_stability_scores"], ref_scores)

    # --- Path 2: N < num_queries (original order + zero padding) ------------
    N2 = 3
    out2 = sam_embedder_forward(masks[:, :N2], features[:, :N2], areas[:, :N2],
                                bboxs[:, :N2], scores[:, :N2], NUM_QUERIES)
    out2 = jax.tree_util.tree_map(jax.block_until_ready, out2)

    assert out2["segmentation_features"].shape == (B, NUM_QUERIES, C)
    assert out2["segmentation_masks"].shape == (B, NUM_QUERIES, H, W)
    assert jnp.allclose(out2["segmentation_features"][:, :N2], ref_pooled[:, :N2])
    assert jnp.all(out2["segmentation_features"][:, N2:] == 0.0)
    assert jnp.allclose(out2["segmentation_masks"][:, :N2].astype(jnp.float32),
                        masks[:, :N2].astype(jnp.float32))
    assert jnp.all(out2["segmentation_masks"][:, N2:].astype(jnp.float32) == 0.0)
    assert jnp.all(out2["segmentation_areas"][:, :N2] == areas[:, :N2])
    assert jnp.all(out2["segmentation_areas"][:, N2:] == 0)

    print("KERNEL_OK")
</pallas_src>

<mosaic_0001>
module attributes {stable_mosaic.version = 11 : i64} {
  func.func @_fused_pool_gather_kernel(%arg0: i32, %arg1: memref<10xi32, #tpu.memory_space<smem>>, %arg2: memref<1x128x4096xbf16, #tpu.memory_space<vmem>>, %arg3: memref<1x1x1024xbf16, #tpu.memory_space<vmem>>, %arg4: memref<1x1x128xf32, #tpu.memory_space<vmem>>, %arg5: memref<1x1x1024xbf16, #tpu.memory_space<vmem>>) attributes {dimension_semantics = [#tpu.dimension_semantics<parallel>], iteration_bounds = array<i64: 10>, scalar_prefetch = 1 : i64, scratch_operands = 0 : i64, tpu.core_type = #tpu.core_type<tc>, window_params = [{transform_indices = @transform_0, window_bounds = array<i64: 1, 128, 4096>}, {transform_indices = @transform_1, window_bounds = array<i64: 1, 1, 1024>}, {transform_indices = @transform_2, window_bounds = array<i64: 1, 1, 128>}, {transform_indices = @transform_3, window_bounds = array<i64: 1, 1, 1024>}]} {
    %c0 = arith.constant 0 : index
    %c0_0 = arith.constant 0 : index
    %c0_1 = arith.constant 0 : index
    %0 = vector.load %arg2[%c0, %c0_0, %c0_1] : memref<1x128x4096xbf16, #tpu.memory_space<vmem>>, vector<1x128x4096xbf16>
    %cst = arith.constant dense<0xFF80> : vector<1x128xbf16>
    %1 = vector.multi_reduction <maximumf>, %0, %cst [2] : vector<1x128x4096xbf16> to vector<1x128xbf16>
    %2 = arith.extf %1 : vector<1x128xbf16> to vector<1x128xf32>
    %c0_2 = arith.constant 0 : index
    %c0_3 = arith.constant 0 : index
    %c0_4 = arith.constant 0 : index
    %3 = vector.load %arg4[%c0_2, %c0_3, %c0_4] : memref<1x1x128xf32, #tpu.memory_space<vmem>>, vector<1x1x128xf32>
    %4 = vector.shape_cast %3 : vector<1x1x128xf32> to vector<1x128xf32>
    %5 = vector.shape_cast %2 : vector<1x128xf32> to vector<1x1x128xf32>
    tpu.vector_store %arg4[%c0_2, %c0_3, %c0_4], %5 {strides = array<i32>} : memref<1x1x128xf32, #tpu.memory_space<vmem>>, vector<1x1x128xf32>,
    %c0_5 = arith.constant 0 : index
    %c0_6 = arith.constant 0 : index
    %c0_7 = arith.constant 0 : index
    %6 = vector.load %arg3[%c0_5, %c0_6, %c0_7] : memref<1x1x1024xbf16, #tpu.memory_space<vmem>>, vector<1x1x1024xbf16>
    %c0_8 = arith.constant 0 : index
    %c0_9 = arith.constant 0 : index
    %c0_10 = arith.constant 0 : index
    %7 = vector.load %arg5[%c0_8, %c0_9, %c0_10] : memref<1x1x1024xbf16, #tpu.memory_space<vmem>>, vector<1x1x1024xbf16>
    tpu.vector_store %arg5[%c0_8, %c0_9, %c0_10], %6 {strides = array<i32>} : memref<1x1x1024xbf16, #tpu.memory_space<vmem>>, vector<1x1x1024xbf16>,
    return
  }
  func.func @transform_0(%arg0: i32, %arg1: memref<10xi32, #tpu.memory_space<smem>>) -> (i32, i32, i32) {
    %0 = arith.index_cast %arg0 : i32 to index
    %1 = memref.load %arg1[%0] : memref<10xi32, #tpu.memory_space<smem>>
    %c0_i32 = arith.constant 0 : i32
    %c0_i32_0 = arith.constant 0 : i32
    %c0_i32_1 = arith.constant 0 : i32
    return %1, %c0_i32, %c0_i32_0 : i32, i32, i32
  }
  func.func @transform_1(%arg0: i32, %arg1: memref<10xi32, #tpu.memory_space<smem>>) -> (i32, i32, i32) {
    %0 = arith.index_cast %arg0 : i32 to index
    %1 = memref.load %arg1[%0] : memref<10xi32, #tpu.memory_space<smem>>
    %c0_i32 = arith.constant 0 : i32
    %c0_i32_0 = arith.constant 0 : i32
    %c0_i32_1 = arith.constant 0 : i32
    return %1, %c0_i32, %c0_i32_0 : i32, i32, i32
  }
  func.func @transform_2(%arg0: i32, %arg1: memref<10xi32, #tpu.memory_space<smem>>) -> (i32, i32, i32) {
    %c0_i32 = arith.constant 0 : i32
    %c0_i32_0 = arith.constant 0 : i32
    %c0_i32_1 = arith.constant 0 : i32
    return %arg0, %c0_i32, %c0_i32_0 : i32, i32, i32
  }
  func.func @transform_3(%arg0: i32, %arg1: memref<10xi32, #tpu.memory_space<smem>>) -> (i32, i32, i32) {
    %c0_i32 = arith.constant 0 : i32
    %c0_i32_0 = arith.constant 0 : i32
    %c0_i32_1 = arith.constant 0 : i32
    return %arg0, %c0_i32, %c0_i32_0 : i32, i32, i32
  }
}

</mosaic_0001>

<bundles_post_ra>
// kernel: tpu_custom_call.1
= control target key start
LH: loop header
LB: loop body
LE: loop exit
PB: predicated region body
PF: predicated region fallthrough
CT: control target
= control target key end

     0   :  { %s2809_s15 = smov [#allocation3]   ;;  %s3630_s0 = inlined_call_operand.hbm [shape: s32[10], index: 0, kind: input, shape index: {}]   ;;  %s3631_s1 = inlined_call_operand.hbm [shape: bf16[16,128,4096], index: 1, kind: input, shape index: {}]   ;;  %s3632_s2 = inlined_call_operand.vmem [shape: bf16[16,1,1024], index: 2, kind: input, shape index: {}]   ;;  %s3633_s3 = inlined_call_operand.hbm [shape: f32[10,1,128], index: 3, kind: output, shape index: {0}]   ;;  %s3634_s4 = inlined_call_operand.vmem [shape: bf16[10,1,1024], index: 4, kind: output, shape index: {1}]  }
   0x1   :  { %11 = dma.hbm_to_smem %s3630_s0, 16, %s2809_s15, [#allocation2] }
   0x2   :  { %2771 = dma.done.wait [#allocation2], 16 }
   0x3   :  { %2772 = vsyncadd [#allocation2], 4294967280 }
   0x4   :  { %13 = sfence }
   0x5   :  { %14 = vsyncpa [#allocation5], 0 }
   0x6   :  { %16 = vsyncpa [#allocation5 + $0x1], 0 }
   0x7   :  { %17 = vsyncpa [#allocation6], 0 }
   0x8   :  { %19 = vsyncpa [#allocation6 + $0x1], 0  ;;  %s2842_s18 = smov 0   ;;  %s2844_s19 = smov 0  }
   0x9   :  { %s2846_s20 = smov 0   ;;  %s2848_s21 = smov 0  }
   0xa   :  { %s2850_s22 = smov 0   ;;  %s2852_s23 = smov 0  }
   0xb   :  { %s2854_s0 = smov 0  }
   0xc LB: > { %s2876_s24 = sadd.s32 4294967295, %s2807_s0   ;;  %s2334_s25 = sadd.s32 4294967294, %s2807_s0   ;;  %s2807_s0 = sphi %s2854_s0, %s3659_s0   ;;  %s2803_s23 = sphi %s2852_s23, %s3658_s23   ;;  %s2799_s22 = sphi %s2850_s22, %s3657_s22   ;;  %s2795_s21 = sphi %s2848_s21, %s3656_s21   ;;  %s2791_s20 = sphi %s2846_s20, %s3655_s20   ;;  %s2787_s19 = sphi %s2844_s19, %s3654_s19   ;;  %s2783_s18 = sphi %s2842_s18, %s3653_s18  }
   0xd   : > { %s2880_s26 = sadd.s32 1, %s2807_s0   ;;  %s29_s27 = sld [smem:[#allocation3 + %s2807_s0]] }
   0xe   : > { %s30_s28 = sld [smem:[#allocation3 + %s2880_s26]]  ;;  %s34_s29 = sadd.s32 1, %s2803_s23 }
   0xf   : > { %p41_p0 = scmp.ne.s32.totalorder %s2803_s23, %s2799_s22  ;;  %p42_p1 = scmp.eq.s32.totalorder %s2807_s0, 0 }
  0x10   : > { %p47_p2 = scmp.ne.s32.totalorder %s2799_s22, %s2795_s21  ;;  %p48_p3 = scmp.eq.s32.totalorder %s2876_s24, 0 }
  0x11   : > { %p2890_p4 = por %p42_p1, %p41_p0  ;;  %s85_s5 = ssub.s32 %s2807_s0, %s2880_s26 }
  0x12   : > { %p2896_p5 = por %p48_p3, %p47_p2  ;;  %p86_p6 = scmp.eq.s32.totalorder %s85_s5, 0 }
  0x13   : > { %s88_s7 = sadd.s32 1, %s2791_s20  ;;  %p98_p7 = scmp.ne.s32.totalorder %s2791_s20, %s2787_s19 }
  0x14   : > { %s3638_s6 = scalar_select %p2896_p5, 1, 0 }
  0x15   : > { %s31_s8 = ssub.s32 %s29_s27, %s30_s28  ;;  %p99_p8 = scmp.eq.s32.totalorder %s2876_s24, 9 }
  0x16   : > { %p32_p9 = scmp.eq.s32.totalorder %s31_s8, 0  ;;  %p104_p10 = scmp.ne.s32.totalorder %s2787_s19, %s2783_s18 }
  0x17   : > { %s2907_s9 = scalar_select %p86_p6, %s2791_s20, %s88_s7  }
  0x18   : > { %s2910_s10 = scalar_select %p32_p9, %s2803_s23, %s34_s29  }
  0x19   : > { %p2912_p11 = por %p99_p8, %p98_p7  ;;  %p105_p12 = scmp.eq.s32.totalorder %s2334_s25, 9 }
  0x1a   : > { %3639 = sst [smem:[#allocation13_spill]] %s2910_s10  ;;  %p2620_p13 = scmp.lt.s32.totalorder %s2807_s0, 10 }
  0x1b   : > { %s3640_s11 = scalar_select %p2912_p11, 1, 0 }
  0x1c   : > { %p2917_p0 = por %p105_p12, %p104_p10  ;;  %s151_s13 = sand.u32 1, %s2803_s23  }
  0x1d   : > { %s2337_s14 = sshll.u32 %s151_s13, 11  ;;  %p2924_p1 = pnand %p2620_p13, %p2890_p4 }
  0x1e   : > { %s3641_s12 = scalar_select %p2917_p0, 1, 0 }
  0x1f   : > { %s2604_s16 = scalar_select %p2890_p4, [#allocation3], [#allocation8] }
  0x20   : > { %s2605_s17 = scalar_select %p2890_p4, %s2807_s0, 0 }
  0x21   : > { %s3661_s16 = smov (!%p2620_p13, %s2604_s16), [#allocation9]  ;;  %s155_s25 = scalar_lea.vmem [#allocation4], %s2337_s14 }
  0x22   : > { %s3663_s17 = smov (!%p2620_p13, %s2605_s17), 0  ;;  %s163_s27 = sshll.u32 %s155_s25, 4  ;;  %s2935_s27 = int_to_ptr.vmem [resolvable:$true] %s163_s27 }
  0x23   : > { %s156_s21 = sld [smem:[%s3661_s16 + %s3663_s17]]  ;;  %p2340_p2 = scmp.ge.s32.totalorder %s2807_s0, 1 }
  0x24   : > { %p180_p3 = scmp.lt.s32.totalorder %s2807_s0, 11  ;;  %s2946_s8 = scalar_lea.sflag [#allocation5], %s151_s13 }
  0x25   : > { %p2691_p7 = pneg %p2924_p1 }
  0x26   : > { %p2937_p6 = pnand %p2340_p2, %p180_p3 }
  0x28   : > { %s3643_s28 = scalar_select %p2937_p6, 1, 0 }
  0x29   : > { %s2603_s29 = sshll.u32 %s156_s21, 15  ;;  %s2694_s21 = scalar_lea.hbm %s3631_s1, 524288 }
  0x2a   : > { %s2944_s30 = scalar_lea.hbm %s3631_s1, %s2603_s29 }
  0x2b   : > { %s2689_s14 = scalar_lea.hbm %s2944_s30, 32768  ;;  %p2695_p10 = scmp.lt.s32.totalorder %s2944_s30, %s3631_s1 }
  0x2c   : > { %p2690_p4 = scmp.ne.s32.totalorder %s2944_s30, %s2689_s14  ;;  %p2696_p12 = scmp.lt.s32.totalorder %s2694_s21, %s2689_s14 }
  0x2e   : > { %p2692_p8 = pnand %p2691_p7, %p2690_p4  ;;  %p2697_p13 = por %p2696_p12, %p2695_p10 }
  0x30   : > { %p2693_p9 = pneg %p2692_p8 }
  0x32   : > { %p2698_p2 = pnand %p2697_p13, %p2693_p9 }
  0x34   : > { %2701 = shalt.err (!%p2698_p2)
}
  0x35   : > { %s2702_s13 = scalar_lea.vmem %s2935_s27, 32768  ;;  %s2810_s29 = smov [#allocation4]  }
  0x36   : > { %p2703_p3 = scmp.ne.s32.totalorder %s2935_s27, %s2702_s13  ;;  %s2707_s5 = sshll.u32 %s2810_s29, 4  ;;  %s2708_s5 = int_to_ptr.vmem [resolvable:$false] %s2707_s5 }
  0x37   : > { %s2709_s7 = scalar_lea.vmem %s2708_s5, 65536  ;;  %p2710_p8 = scmp.lt.s32.totalorder %s2935_s27, %s2708_s5 }
  0x38   : > { %p2705_p0 = pnand %p2703_p3, %p2691_p7  ;;  %p2711_p11 = scmp.lt.s32.totalorder %s2709_s7, %s2702_s13 }
  0x3a   : > { %p2706_p4 = pneg %p2705_p0  ;;  %p2712_p5 = por %p2711_p11, %p2710_p8 }
  0x3c   : > { %p2713_p6 = pnand %p2712_p5, %p2706_p4 }
  0x3e   : > { %2716 = shalt.err (!%p2713_p6)
}
  0x3f   : > { %s2811_s10 = smov 2048   ;;  %s2812_s14 = smov 128  }
  0x40   : > { %2615 = dma.hbm_to_vmem [thread:$0]  (!%p2924_p1), %s2944_s30, 32768, %s2935_s27, %s2946_s8, %s2811_s10, %s2811_s10, %s2812_s14  }
  0x41   : > { %p3644_p7 = scmp.ne.s32.totalorder %s3643_s28, 0 }
  0x42   : > { %s186_s16 = sand.u32 (!%p3644_p7), 1, %s2799_s22   ;;  %p3645_p5 = scmp.ne.s32.totalorder (!%p3644_p7), %s3638_s6, 0 }
  0x43   : > { %184 = sbr.rel (%p3644_p7) target bundleno = 402 (0x192), region = 28  ;;  %s2341_s17 = sshll.u32 (!%p3644_p7), %s186_s16, 11 }
  0x44   : > { %s187_s21 = scalar_lea.sflag (!%p3644_p7), [#allocation5], %s186_s16  ;;  %s2970_s25 = scalar_lea.vmem (!%p3644_p7), [#allocation4], %s2341_s17 }
  0x48   : > { %2774 = dma.done.wait (%p3645_p5), %s187_s21, 32768  }
  0x49   : > { %2776 = vsyncadd (%p3645_p5), %s187_s21, 4294934528  ;;  %p228_p11 = scmp.lt.s32.totalorder %s2876_s24, 9  ;;  %vm2178_vm0 = vcmask 1040384   ;;  %vm2179_vm1 = vsmask.f32 256  ;;  %vm2181_vm2 = vcmask 1041409  }
  0x4a   : > { %s222_s15 = sld [smem:[#allocation3 + %s2876_s24]]  ;;  %vm2180_vm3 = vmand %vm2178_vm0, %vm2179_vm1  ;;  %vm2182_vm4 = vsmask.f32 1280  ;;  %vm2185_vm5 = vcmask 1042434   ;;  %vm2186_vm6 = vsmask.f32 2304 }
  0x4b   : > { %vm2183_vm7 = vmand %vm2181_vm2, %vm2182_vm4  ;;  %s229_s27 = scalar_select %p228_p11, %s2876_s24, 9  ;;  %vm2189_vm9 = vcmask 1043459   ;;  %vm2190_vm10 = vsmask.f32 3328  ;;  %vm2193_vm13 = vcmask 1044484   ;;  %vm2197_vm1 = vcmask 1045509  }
  0x4c   : > { %vm2184_vm8 = vmor %vm2183_vm7, %vm2180_vm3  ;;  %vm2194_vm14 = vsmask.f32 4352  ;;  %vm2198_vm2 = vsmask.f32 5376  ;;  %vm2201_vm7 = vcmask 1046534   ;;  %v232_v3 = vld [vmem:[%s2970_s25] sm:$0xff] }
  0x4d   : > { %vm2187_vm11 = vmand %vm2185_vm5, %vm2186_vm6  ;;  %s2343_s6 = sshll.u32 %s229_s27, 3  ;;  %vm2202_vm5 = vsmask.f32 6400  ;;  %v248_v4 = vld [vmem:[%s2970_s25 + $0x80] sm:$0xff]  ;;  %v233_v5 = vld [vmem:[%s2970_s25 + $0x8] sm:$0xff]  ;;  %s213_s10 = sand.u32 1, %s2787_s19  }
  0x4e   : > { %vm2188_vm12 = vmor %vm2187_vm11, %vm2184_vm8  ;;  %s231_s8 = scalar_lea.vmem %s3634_s4, %s2343_s6  ;;  %v249_v6 = vld [vmem:[%s2970_s25 + $0x88] sm:$0xff]  ;;  %v2344_v7 = vcombine.low %v232_v3, %v248_v4  ;;  %v2345_v8 = vcombine.high %v232_v3, %v248_v4  ;;  %v234_v10 = vld [vmem:[%s2970_s25 + $0x10] sm:$0xff]  ;;  %s2600_s14 = sshll.u32 %s2876_s24, 4 }
  0x4f   : > { %vm2191_vm15 = vmand %vm2189_vm9, %vm2190_vm10  ;;  %vm2205_vm9 = vcmask 1047559   ;;  %vm2206_vm10 = vsmask.f32 7424  ;;  %v2209_v1 = vld [vmem:[%s231_s8] sm:$0xff]  ;;  %v2346_v9 = vcombine.low %v233_v5, %v249_v6  ;;  %v250_v11 = vld [vmem:[%s2970_s25 + $0x90] sm:$0xff]  ;;  %v2347_v12 = vcombine.high %v233_v5, %v249_v6  ;;  %s214_s16 = scalar_lea.vmem [#allocation7], %s213_s10 }
  0x50   : > { %p223_p0 = scmp.lt.s32.totalorder %s222_s15, 15  ;;  %vm2192_vm0 = vmor %vm2191_vm15, %vm2188_vm12  ;;  %v1768_v13 = vmax.bf16 %v2345_v8, %v2344_v7  ;;  %v2348_v14 = vcombine.low %v234_v10, %v250_v11  ;;  %v235_v16 = vld [vmem:[%s2970_s25 + $0x18] sm:$0xff]  ;;  %v2349_v18 = vcombine.high %v234_v10, %v250_v11  ;;  %v296_v20 = vld [vmem:[%s2970_s25 + $0x200] sm:$0xff]  ;;  %vm2075_vm15 = vcmask 130112   ;;  %s2229_s17 = sshll.u32 %s214_s16, 4  ;;  %s2230_s17 = int_to_ptr.vmem [resolvable:$true] %s2229_s17 }
  0x51   : > { %vm2195_vm4 = vmand %vm2193_vm13, %vm2194_vm14  ;;  %v251_v17 = vld [vmem:[%s2970_s25 + $0x98] sm:$0xff]  ;;  %v312_v21 = vld [vmem:[%s2970_s25 + $0x280] sm:$0xff]  ;;  %s2213_s27 = scalar_lea.sflag [#allocation6], %s213_s10  ;;  %s2717_s6 = scalar_lea.vmem %s2230_s17, 16 }
  0x52   : > { %s3665_s15 = smov (!%p223_p0, %s222_s15), 15  ;;  %vm2196_vm3 = vmor %vm2195_vm4, %vm2192_vm0  ;;  %v1769_v15 = vmax.bf16 %v2346_v9, %v1768_v13  ;;  %v2350_v22 = vcombine.low %v235_v16, %v251_v17  ;;  %v297_v24 = vld [vmem:[%s2970_s25 + $0x208] sm:$0xff]  ;;  %v236_v26 = vld [vmem:[%s2970_s25 + $0x20] sm:$0xff]  ;;  %v2408_v28 = vcombine.low %v296_v20, %v312_v21  ;;  %v2409_v29 = vcombine.high %v296_v20, %v312_v21  ;;  %p2718_p1 = scmp.ne.s32.totalorder %s2230_s17, %s2717_s6 }
  0x53   : > { %vm2199_vm6 = vmand %vm2197_vm1, %vm2198_vm2  ;;  %s2342_s13 = sshll.u32 %s3665_s15, 3  ;;  %v313_v25 = vld [vmem:[%s2970_s25 + $0x288] sm:$0xff]  ;;  %v252_v27 = vld [vmem:[%s2970_s25 + $0xa0] sm:$0xff]  ;;  %v2351_v30 = vcombine.high %v235_v16, %v251_v17  ;;  %vm2082_vm0 = vcmask 195712   ;;  %vm2089_vm1 = vcmask 261312   ;;  %vm2096_vm2 = vcmask 326912   ;;  %s3586_s15 = scalar_lea.hbm %s3633_s3, %s2600_s14 }
  0x54   : > { %vm2200_vm8 = vmor %vm2199_vm6, %vm2196_vm3  ;;  %s226_s7 = scalar_lea.vmem %s3632_s2, %s2342_s13  ;;  %v1770_v19 = vmax.bf16 %v2347_v12, %v1769_v15  ;;  %v2410_v32 = vcombine.low %v297_v24, %v313_v25  ;;  %v2352_v33 = vcombine.low %v236_v26, %v252_v27  ;;  %v298_v35 = vld [vmem:[%s2970_s25 + $0x210] sm:$0xff]  ;;  %v237_v37 = vld [vmem:[%s2970_s25 + $0x28] sm:$0xff]  ;;  %v2411_v39 = vcombine.high %v297_v24, %v313_v25  ;;  %p3650_p6 = scmp.ne.s32.totalorder %s3640_s11, 0 }
  0x55   : > { %vm2203_vm11 = vmand %vm2201_vm7, %vm2202_vm5  ;;  %v2177_v0 = vld [vmem:[%s226_s7] sm:$0xff]  ;;  %v314_v36 = vld [vmem:[%s2970_s25 + $0x290] sm:$0xff]  ;;  %v1834_v40 = vmax.bf16 %v2409_v29, %v2408_v28  ;;  %v2353_v41 = vcombine.high %v236_v26, %v252_v27  ;;  %vm2103_vm4 = vcmask 392512   ;;  %vm2110_vm3 = vcmask 458112   ;;  %s2813_s24 = smov [#allocation7]  }
  0x56   : > { %vm2204_vm12 = vmor %vm2203_vm11, %vm2200_vm8  ;;  %v1771_v23 = vmax.bf16 %v2348_v14, %v1770_v19  ;;  %v253_v38 = vld [vmem:[%s2970_s25 + $0xa8] sm:$0xff]  ;;  %v2412_v43 = vcombine.low %v298_v35, %v314_v36  ;;  %v299_v47 = vld [vmem:[%s2970_s25 + $0x218] sm:$0xff]  ;;  %v2413_v52 = vcombine.high %v298_v35, %v314_v36  ;;  %vm2117_vm7 = vcmask 523712   ;;  %p2719_p9 = pnand %p2718_p1, %p3650_p6  ;;  %s2721_s28 = sshll.u32 %s2813_s24, 4  ;;  %s2722_s28 = int_to_ptr.vmem [resolvable:$false] %s2721_s28 }
  0x57   : > { %vm2207_vm13 = vmand %vm2205_vm9, %vm2206_vm10  ;;  %v1835_v44 = vmax.bf16 %v2410_v32, %v1834_v40  ;;  %v2354_v45 = vcombine.low %v237_v37, %v253_v38  ;;  %v315_v48 = vld [vmem:[%s2970_s25 + $0x298] sm:$0xff]  ;;  %v238_v49 = vld [vmem:[%s2970_s25 + $0x30] sm:$0xff]  ;;  %v2355_v55 = vcombine.high %v237_v37, %v253_v38  ;;  %vm2124_vm5 = vcmask 589312   ;;  %s2723_s30 = scalar_lea.vmem %s2722_s28, 32  ;;  %p2724_p12 = scmp.lt.s32.totalorder %s2230_s17, %s2722_s28 }
  0x58   : > { %vm2208_vm14 = vmor %vm2207_vm13, %vm2204_vm12  ;;  %v1772_v31 = vmax.bf16 %v2349_v18, %v1771_v23  ;;  %v3007_v50 = vld [vmem:[%s2970_s25 + $0x38] sm:$0xff]  ;;  %v254_v51 = vld [vmem:[%s2970_s25 + $0xb0] sm:$0xff]  ;;  %v2414_v62 = vcombine.low %v299_v47, %v315_v48  ;;  %v2415_v7 = vcombine.high %v299_v47, %v315_v48  ;;  %vm2131_vm6 = vcmask 654912   ;;  %p2720_p10 = pneg %p2719_p9  ;;  %p2725_p13 = scmp.lt.s32.totalorder %s2723_s30, %s2717_s6 }
  0x59   : > { %v2210_v2 = vsel %vm2208_vm14, %v2177_v0, %v2209_v1  ;;  %v1836_v53 = vmax.bf16 %v2411_v39, %v1835_v44  ;;  %v3011_v54 = vld [vmem:[%s2970_s25 + $0x40] sm:$0xff]  ;;  %v3016_v59 = vld [vmem:[%s2970_s25 + $0xb8] sm:$0xff]  ;;  %v2356_v0 = vcombine.low %v238_v49, %v254_v51  ;;  %v265_v3 = vld [vmem:[%s2970_s25 + $0x108] sm:$0xff]  ;;  %v2357_v13 = vcombine.high %v238_v49, %v254_v51 }
  0x5a   : > { %2211 = vst [vmem:[%s231_s8] sm:$0xff] %v2210_v2  ;;  %v1773_v34 = vmax.bf16 %v2350_v22, %v1772_v31  ;;  %v264_v57 = vld [vmem:[%s2970_s25 + $0x100] sm:$0xff]  ;;  %v281_v4 = vld [vmem:[%s2970_s25 + $0x188] sm:$0xff]  ;;  %v3034_v11 = vld [vmem:[%s2970_s25 + $0x50] sm:$0xff]  ;;  %v2358_v14 = vcombine.low %v3007_v50, %v3016_v59  ;;  %v2359_v15 = vcombine.high %v3007_v50, %v3016_v59  ;;  %vm2138_vm8 = vcmask 720512   ;;  %p2726_p2 = por %p2725_p13, %p2724_p12 }
  0x5b   : > { %v280_v58 = vld [vmem:[%s2970_s25 + $0x180] sm:$0xff]  ;;  %v1837_v63 = vmax.bf16 %v2412_v43, %v1836_v53  ;;  %v3028_v5 = vld [vmem:[%s2970_s25 + $0x48] sm:$0xff]  ;;  %v3037_v12 = vld [vmem:[%s2970_s25 + $0x58] sm:$0xff]  ;;  %v2378_v23 = vcombine.low %v265_v3, %v281_v4  ;;  %v2379_v35 = vcombine.high %v265_v3, %v281_v4  ;;  %vm2145_vm9 = vcmask 786112  }
  0x5c   : > { %v1774_v42 = vmax.bf16 %v2351_v30, %v1773_v34  ;;  %v3019_v60 = vld [vmem:[%s2970_s25 + $0xc0] sm:$0xff]  ;;  %v3031_v6 = vld [vmem:[%s2970_s25 + $0xc8] sm:$0xff]  ;;  %v2376_v9 = vcombine.low %v264_v57, %v280_v58  ;;  %v2377_v10 = vcombine.high %v264_v57, %v280_v58  ;;  %v3044_v17 = vld [vmem:[%s2970_s25 + $0xd0] sm:$0xff]  ;;  %vm2152_vm10 = vcmask 851712   ;;  %p2727_p3 = pnand %p2726_p2, %p2720_p10 }
  0x5d   : > { %v3022_v61 = vld [vmem:[%s2970_s25 + $0x220] sm:$0xff]  ;;  %v1838_v8 = vmax.bf16 %v2413_v52, %v1837_v63  ;;  %v3047_v18 = vld [vmem:[%s2970_s25 + $0xd8] sm:$0xff]  ;;  %v2360_v19 = vcombine.low %v3011_v54, %v3019_v60  ;;  %v3052_v20 = vld [vmem:[%s2970_s25 + $0x228] sm:$0xff]  ;;  %v2361_v24 = vcombine.high %v3011_v54, %v3019_v60  ;;  %v2362_v25 = vcombine.low %v3028_v5, %v3031_v6 }
  0x5e   : > { %v1775_v46 = vmax.bf16 %v2352_v33, %v1774_v42  ;;  %v316_v2 = vld [vmem:[%s2970_s25 + $0x2a0] sm:$0xff]  ;;  %v2363_v26 = vcombine.high %v3028_v5, %v3031_v6  ;;  %v317_v28 = vld [vmem:[%s2970_s25 + $0x2a8] sm:$0xff]  ;;  %v266_v29 = vld [vmem:[%s2970_s25 + $0x110] sm:$0xff]  ;;  %v1801_v36 = vmax.bf16 %v2377_v10, %v2376_v9  ;;  %v2364_v39 = vcombine.low %v3034_v11, %v3044_v17 }
  0x5f   : > { %v2416_v21 = vcombine.low %v3022_v61, %v316_v2  ;;  %v1839_v22 = vmax.bf16 %v2414_v62, %v1838_v8  ;;  %v282_v30 = vld [vmem:[%s2970_s25 + $0x190] sm:$0xff]  ;;  %v3065_v31 = vld [vmem:[%s2970_s25 + $0x60] sm:$0xff]  ;;  %v2417_v33 = vcombine.high %v3022_v61, %v316_v2  ;;  %v3072_v37 = vld [vmem:[%s2970_s25 + $0x68] sm:$0xff]  ;;  %v2365_v40 = vcombine.high %v3034_v11, %v3044_v17 }
  0x60   : > { %v1776_v56 = vmax.bf16 %v2353_v41, %v1775_v46  ;;  %v3068_v32 = vld [vmem:[%s2970_s25 + $0xe0] sm:$0xff]  ;;  %v3075_v38 = vld [vmem:[%s2970_s25 + $0x70] sm:$0xff]  ;;  %v2366_v41 = vcombine.low %v3037_v12, %v3047_v18  ;;  %v3084_v43 = vld [vmem:[%s2970_s25 + $0xe8] sm:$0xff]  ;;  %v2418_v46 = vcombine.low %v3052_v20, %v317_v28  ;;  %v2380_v48 = vcombine.low %v266_v29, %v282_v30 }
  0x61   : > { %v1840_v34 = vmax.bf16 %v2415_v7, %v1839_v22  ;;  %v3087_v44 = vld [vmem:[%s2970_s25 + $0xf0] sm:$0xff]  ;;  %v1802_v49 = vmax.bf16 %v2378_v23, %v1801_v36  ;;  %v2367_v50 = vcombine.high %v3037_v12, %v3047_v18  ;;  %v2368_v51 = vcombine.low %v3065_v31, %v3068_v32  ;;  %v283_v57 = vld [vmem:[%s2970_s25 + $0x198] sm:$0xff]  ;;  %v288_v12 = vld [vmem:[%s2970_s25 + $0x1c0] sm:$0xff] }
  0x62   : > { %v1777_v1 = vmax.bf16 %v2354_v45, %v1776_v56  ;;  %v3090_v45 = vld [vmem:[%s2970_s25 + $0x230] sm:$0xff]  ;;  %v2369_v52 = vcombine.high %v3065_v31, %v3068_v32  ;;  %v267_v56 = vld [vmem:[%s2970_s25 + $0x118] sm:$0xff]  ;;  %v2419_v61 = vcombine.high %v3052_v20, %v317_v28  ;;  %v2381_v63 = vcombine.high %v266_v29, %v282_v30  ;;  %v344_v20 = vld [vmem:[%s2970_s25 + $0x380] sm:$0xff] }
  0x63   : > { %v1841_v47 = vmax.bf16 %v2416_v21, %v1840_v34  ;;  %v3103_v58 = vld [vmem:[%s2970_s25 + $0x78] sm:$0xff]  ;;  %v2371_v2 = vcombine.high %v3072_v37, %v3084_v43  ;;  %v2372_v3 = vcombine.low %v3075_v38, %v3087_v44  ;;  %v2373_v21 = vcombine.high %v3075_v38, %v3087_v44  ;;  %v268_v28 = vld [vmem:[%s2970_s25 + $0x120] sm:$0xff] }
  0x64   : > { %v1778_v16 = vmax.bf16 %v2355_v55, %v1777_v1  ;;  %v318_v55 = vld [vmem:[%s2970_s25 + $0x2b0] sm:$0xff]  ;;  %v3106_v59 = vld [vmem:[%s2970_s25 + $0xf8] sm:$0xff]  ;;  %v2370_v1 = vcombine.low %v3072_v37, %v3084_v43  ;;  %v284_v29 = vld [vmem:[%s2970_s25 + $0x1a0] sm:$0xff]  ;;  %vm2159_vm11 = vcmask 917312   ;;  %vm2166_vm12 = vcmask 982912  }
  0x65   : > { %v1842_v62 = vmax.bf16 %v2417_v33, %v1841_v47  ;;  %v3116_v7 = vld [vmem:[%s2970_s25 + $0x238] sm:$0xff]  ;;  %v2420_v9 = vcombine.low %v3090_v45, %v318_v55  ;;  %v3136_v30 = vld [vmem:[%s2970_s25 + $0x2c0] sm:$0xff]  ;;  %v2421_v33 = vcombine.high %v3090_v45, %v318_v55  ;;  %v3145_v47 = vld [vmem:[%s2970_s25 + $0x248] sm:$0xff]  ;;  %v2384_v60 = vcombine.low %v268_v28, %v284_v29 }
  0x66   : > { %v1779_v27 = vmax.bf16 %v2356_v0, %v1778_v16  ;;  %v1803_v0 = vmax.bf16 %v2379_v35, %v1802_v49  ;;  %v3119_v8 = vld [vmem:[%s2970_s25 + $0x2b8] sm:$0xff]  ;;  %v328_v16 = vld [vmem:[%s2970_s25 + $0x300] sm:$0xff]  ;;  %v2383_v35 = vcombine.high %v267_v56, %v283_v57  ;;  %v3153_v55 = vld [vmem:[%s2970_s25 + $0x250] sm:$0xff]  ;;  %vm2173_vm13 = vcmask 1048512  }
  0x67   : > { %v1843_v10 = vmax.bf16 %v2418_v46, %v1842_v62  ;;  %v345_v46 = vld [vmem:[%s2970_s25 + $0x388] sm:$0xff]  ;;  %v2422_v49 = vcombine.low %v3116_v7, %v3119_v8  ;;  %v2440_v45 = vcombine.low %v328_v16, %v344_v20  ;;  %v3240_v22 = vld [vmem:[%s2970_s25 + $0x2f8] sm:$0xff]  ;;  %v3314_v44 = vld [vmem:[%s2970_s25 + $0x160] sm:$0xff] }
  0x68   : > { %v1780_v42 = vmax.bf16 %v2357_v13, %v1779_v27  ;;  %v2382_v13 = vcombine.low %v267_v56, %v283_v57  ;;  %v3131_v27 = vld [vmem:[%s2970_s25 + $0x240] sm:$0xff]  ;;  %v2423_v56 = vcombine.high %v3116_v7, %v3119_v8 }
  0x69   : > { %v1844_v34 = vmax.bf16 %v2419_v61, %v1843_v10  ;;  %v3161_v61 = vld [vmem:[%s2970_s25 + $0x2d0] sm:$0xff]  ;;  %v2424_v62 = vcombine.low %v3131_v27, %v3136_v30  ;;  %v2385_v10 = vcombine.high %v268_v28, %v284_v29  ;;  %v3185_v28 = vld [vmem:[%s2970_s25 + $0x260] sm:$0xff] }
  0x6a   : > { %v1781_v53 = vmax.bf16 %v2358_v14, %v1780_v42  ;;  %v1804_v14 = vmax.bf16 %v2380_v48, %v1803_v0  ;;  %v329_v42 = vld [vmem:[%s2970_s25 + $0x308] sm:$0xff]  ;;  %v2428_v29 = vcombine.low %v3153_v55, %v3161_v61 }
  0x6b   : > { %v3148_v48 = vld [vmem:[%s2970_s25 + $0x2c8] sm:$0xff]  ;;  %v1845_v54 = vmax.bf16 %v2420_v9, %v1844_v34  ;;  %v2442_v7 = vcombine.low %v329_v42, %v345_v46 }
  0x6c   : > { %v1782_v4 = vmax.bf16 %v2359_v15, %v1781_v53  ;;  %v2374_v15 = vcombine.low %v3103_v58, %v3106_v59  ;;  %v1805_v36 = vmax.bf16 %v2381_v63, %v1804_v14  ;;  %v2441_v53 = vcombine.high %v328_v16, %v344_v20  ;;  %v269_v0 = vld [vmem:[%s2970_s25 + $0x128] sm:$0xff]  ;;  %v346_v14 = vld [vmem:[%s2970_s25 + $0x390] sm:$0xff]  ;;  %v3177_v20 = vld [vmem:[%s2970_s25 + $0x258] sm:$0xff] }
  0x6d   : > { %v2425_v63 = vcombine.high %v3131_v27, %v3136_v30  ;;  %v2426_v8 = vcombine.low %v3145_v47, %v3148_v48  ;;  %v1846_v9 = vmax.bf16 %v2421_v33, %v1845_v54  ;;  %v2427_v27 = vcombine.high %v3145_v47, %v3148_v48  ;;  %v273_v48 = vld [vmem:[%s2970_s25 + $0x148] sm:$0xff] }
  0x6e   : > { %v1783_v23 = vmax.bf16 %v2360_v19, %v1782_v4  ;;  %v285_v4 = vld [vmem:[%s2970_s25 + $0x1a8] sm:$0xff]  ;;  %v2443_v30 = vcombine.high %v329_v42, %v345_v46  ;;  %v1867_v33 = vmax.bf16 %v2441_v53, %v2440_v45  ;;  %v270_v42 = vld [vmem:[%s2970_s25 + $0x130] sm:$0xff] }
  0x6f   : > { %v1847_v34 = vmax.bf16 %v2422_v49, %v1846_v9  ;;  %v2386_v5 = vcombine.low %v269_v0, %v285_v4  ;;  %v286_v46 = vld [vmem:[%s2970_s25 + $0x1b0] sm:$0xff]  ;;  %v2387_v54 = vcombine.high %v269_v0, %v285_v4  ;;  %v3207_v9 = vld [vmem:[%s2970_s25 + $0x268] sm:$0xff] }
  0x70   : > { %v1784_v19 = vmax.bf16 %v2361_v24, %v1783_v23  ;;  %v1806_v24 = vmax.bf16 %v2382_v13, %v1805_v36  ;;  %v3180_v23 = vld [vmem:[%s2970_s25 + $0x2d8] sm:$0xff]  ;;  %v2429_v36 = vcombine.high %v3153_v55, %v3161_v61  ;;  %v1868_v45 = vmax.bf16 %v2442_v7, %v1867_v33  ;;  %v3215_v0 = vld [vmem:[%s2970_s25 + $0x270] sm:$0xff] }
  0x71   : > { %v2430_v49 = vcombine.low %v3177_v20, %v3180_v23  ;;  %v1848_v53 = vmax.bf16 %v2423_v56, %v1847_v34  ;;  %v2431_v7 = vcombine.high %v3177_v20, %v3180_v23  ;;  %v2388_v11 = vcombine.low %v270_v42, %v286_v46  ;;  %v3223_v33 = vld [vmem:[%s2970_s25 + $0x2f0] sm:$0xff]  ;;  %v275_v23 = vld [vmem:[%s2970_s25 + $0x158] sm:$0xff] }
  0x72   : > { %v1785_v57 = vmax.bf16 %v2362_v25, %v1784_v19  ;;  %v1807_v13 = vmax.bf16 %v2383_v35, %v1806_v24  ;;  %v330_v25 = vld [vmem:[%s2970_s25 + $0x310] sm:$0xff]  ;;  %v3193_v35 = vld [vmem:[%s2970_s25 + $0x2e0] sm:$0xff]  ;;  %v331_v24 = vld [vmem:[%s2970_s25 + $0x318] sm:$0xff]  ;;  %v1869_v56 = vmax.bf16 %v2443_v30, %v1868_v45 }
  0x73   : > { %v2444_v19 = vcombine.low %v330_v25, %v346_v14  ;;  %v2432_v4 = vcombine.low %v3185_v28, %v3193_v35  ;;  %v287_v30 = vld [vmem:[%s2970_s25 + $0x1b8] sm:$0xff]  ;;  %v274_v61 = vld [vmem:[%s2970_s25 + $0x150] sm:$0xff] }
  0x74   : > { %v1786_v16 = vmax.bf16 %v2363_v26, %v1785_v57  ;;  %v1808_v6 = vmax.bf16 %v2384_v60, %v1807_v13  ;;  %v3210_v13 = vld [vmem:[%s2970_s25 + $0x2e8] sm:$0xff] }
  0x76   : > { %v1787_v26 = vmax.bf16 %v2364_v39, %v1786_v16  ;;  %v1809_v60 = vmax.bf16 %v2385_v10, %v1808_v6  ;;  %v347_v39 = vld [vmem:[%s2970_s25 + $0x398] sm:$0xff]  ;;  %v2445_v16 = vcombine.high %v330_v25, %v346_v14  ;;  %v1849_v10 = vmax.bf16 %v2424_v62, %v1848_v53  ;;  %v332_v53 = vld [vmem:[%s2970_s25 + $0x320] sm:$0xff] }
  0x77   : > { %v2433_v25 = vcombine.high %v3185_v28, %v3193_v35  ;;  %v271_v14 = vld [vmem:[%s2970_s25 + $0x138] sm:$0xff]  ;;  %v2446_v34 = vcombine.low %v331_v24, %v347_v39  ;;  %v1870_v6 = vmax.bf16 %v2444_v19, %v1869_v56  ;;  %v2435_v19 = vcombine.high %v3207_v9, %v3210_v13  ;;  %v364_v28 = vld [vmem:[%s2970_s25 + $0x420] sm:$0xff] }
  0x78   : > { %v1788_v57 = vmax.bf16 %v2365_v40, %v1787_v26  ;;  %v1810_v17 = vmax.bf16 %v2386_v5, %v1809_v60  ;;  %v1850_v5 = vmax.bf16 %v2425_v63, %v1849_v10  ;;  %v2389_v26 = vcombine.high %v270_v42, %v286_v46  ;;  %v348_v60 = vld [vmem:[%s2970_s25 + $0x3a0] sm:$0xff]  ;;  %v361_v10 = vld [vmem:[%s2970_s25 + $0x408] sm:$0xff] }
  0x79   : > { %v2447_v56 = vcombine.high %v331_v24, %v347_v39  ;;  %v1871_v62 = vmax.bf16 %v2445_v16, %v1870_v6  ;;  %v272_v46 = vld [vmem:[%s2970_s25 + $0x140] sm:$0xff]  ;;  %v2390_v18 = vcombine.low %v271_v14, %v287_v30  ;;  %v2448_v24 = vcombine.low %v332_v53, %v348_v60  ;;  %v333_v6 = vld [vmem:[%s2970_s25 + $0x328] sm:$0xff] }
  0x7a   : > { %v1789_v40 = vmax.bf16 %v2366_v41, %v1788_v57  ;;  %v1811_v45 = vmax.bf16 %v2387_v54, %v1810_v17  ;;  %v3237_v57 = vld [vmem:[%s2970_s25 + $0x278] sm:$0xff]  ;;  %v1851_v42 = vmax.bf16 %v2426_v8, %v1850_v5  ;;  %v360_v16 = vld [vmem:[%s2970_s25 + $0x400] sm:$0xff]  ;;  %v349_v5 = vld [vmem:[%s2970_s25 + $0x3a8] sm:$0xff] }
  0x7b   : > { %v1872_v39 = vmax.bf16 %v2446_v34, %v1871_v62  ;;  %v376_v8 = vld [vmem:[%s2970_s25 + $0x480] sm:$0xff]  ;;  %v2438_v17 = vcombine.low %v3237_v57, %v3240_v22  ;;  %v2392_v34 = vcombine.low %v272_v46, %v288_v12  ;;  %v2449_v62 = vcombine.high %v332_v53, %v348_v60  ;;  %v377_v63 = vld [vmem:[%s2970_s25 + $0x488] sm:$0xff] }
  0x7c   : > { %v1790_v41 = vmax.bf16 %v2367_v50, %v1789_v40  ;;  %v1812_v50 = vmax.bf16 %v2388_v11, %v1811_v45  ;;  %v1852_v11 = vmax.bf16 %v2427_v27, %v1851_v42  ;;  %v2391_v40 = vcombine.high %v271_v14, %v287_v30  ;;  %v289_v27 = vld [vmem:[%s2970_s25 + $0x1c8] sm:$0xff]  ;;  %v334_v42 = vld [vmem:[%s2970_s25 + $0x330] sm:$0xff]  ;;  %v380_v35 = vld [vmem:[%s2970_s25 + $0x4a0] sm:$0xff] }
  0x7d   : > { %v2472_v30 = vcombine.low %v360_v16, %v376_v8  ;;  %v2439_v32 = vcombine.high %v3237_v57, %v3240_v22  ;;  %v2393_v60 = vcombine.high %v272_v46, %v288_v12  ;;  %v2475_v12 = vcombine.high %v361_v10, %v377_v63  ;;  %v295_v22 = vld [vmem:[%s2970_s25 + $0x1f8] sm:$0xff] }
  0x7e   : > { %v1791_v54 = vmax.bf16 %v2368_v51, %v1790_v41  ;;  %v1813_v51 = vmax.bf16 %v2389_v26, %v1812_v50  ;;  %v1873_v41 = vmax.bf16 %v2447_v56, %v1872_v39  ;;  %v1853_v47 = vmax.bf16 %v2428_v29, %v1852_v11 }
  0x7f   : > { %v2473_v26 = vcombine.high %v360_v16, %v376_v8  ;;  %v2474_v50 = vcombine.low %v361_v10, %v377_v63  ;;  %v2451_v39 = vcombine.high %v333_v6, %v349_v5  ;;  %v362_v8 = vld [vmem:[%s2970_s25 + $0x410] sm:$0xff]  ;;  %v2395_v43 = vcombine.high %v273_v48, %v289_v27 }
  0x80   : > { %v1792_v45 = vmax.bf16 %v2369_v52, %v1791_v54  ;;  %v1814_v14 = vmax.bf16 %v2390_v18, %v1813_v51  ;;  %v2450_v52 = vcombine.low %v333_v6, %v349_v5  ;;  %v1874_v53 = vmax.bf16 %v2448_v24, %v1873_v41  ;;  %v350_v18 = vld [vmem:[%s2970_s25 + $0x3b0] sm:$0xff]  ;;  %v335_v6 = vld [vmem:[%s2970_s25 + $0x338] sm:$0xff] }
  0x81   : > { %v1854_v29 = vmax.bf16 %v2429_v36, %v1853_v47  ;;  %v2394_v54 = vcombine.low %v273_v48, %v289_v27  ;;  %v378_v24 = vld [vmem:[%s2970_s25 + $0x490] sm:$0xff]  ;;  %v1900_v11 = vmax.bf16 %v2473_v26, %v2472_v30  ;;  %v351_v5 = vld [vmem:[%s2970_s25 + $0x3b8] sm:$0xff] }
  0x82   : > { %v1793_v31 = vmax.bf16 %v2370_v1, %v1792_v45  ;;  %v1815_v56 = vmax.bf16 %v2391_v40, %v1814_v14  ;;  %v1875_v16 = vmax.bf16 %v2449_v62, %v1874_v53  ;;  %v290_v36 = vld [vmem:[%s2970_s25 + $0x1d0] sm:$0xff]  ;;  %v2476_v63 = vcombine.low %v362_v8, %v378_v24  ;;  %v363_v41 = vld [vmem:[%s2970_s25 + $0x418] sm:$0xff]  ;;  %v336_v53 = vld [vmem:[%s2970_s25 + $0x340] sm:$0xff] }
  0x83   : > { %v1855_v55 = vmax.bf16 %v2430_v49, %v1854_v29  ;;  %v1901_v10 = vmax.bf16 %v2474_v50, %v1900_v11  ;;  %v379_v47 = vld [vmem:[%s2970_s25 + $0x498] sm:$0xff]  ;;  %v2477_v27 = vcombine.high %v362_v8, %v378_v24  ;;  %v2454_v30 = vcombine.low %v335_v6, %v351_v5  ;;  %v352_v29 = vld [vmem:[%s2970_s25 + $0x3c0] sm:$0xff]  ;;  %v3343_v11 = vld [vmem:[%s2970_s25 + $0x428] sm:$0xff] }
  0x84   : > { %v1794_v1 = vmax.bf16 %v2371_v2, %v1793_v31  ;;  %v1816_v46 = vmax.bf16 %v2392_v34, %v1815_v56  ;;  %v2452_v2 = vcombine.low %v334_v42, %v350_v18  ;;  %v1876_v40 = vmax.bf16 %v2450_v52, %v1875_v16  ;;  %v3320_v31 = vld [vmem:[%s2970_s25 + $0x1e0] sm:$0xff]  ;;  %v3336_v16 = vld [vmem:[%s2970_s25 + $0x1e8] sm:$0xff] }
  0x85   : > { %v1856_v49 = vmax.bf16 %v2431_v7, %v1855_v55  ;;  %v2453_v34 = vcombine.high %v334_v42, %v350_v18  ;;  %v291_v7 = vld [vmem:[%s2970_s25 + $0x1d8] sm:$0xff]  ;;  %v1902_v14 = vmax.bf16 %v2475_v12, %v1901_v10  ;;  %v3646_v56 = vcombine.high %v3103_v58, %v3106_v59 }
  0x86   : > { %v1795_v37 = vmax.bf16 %v2372_v3, %v1794_v1  ;;  %v1817_v51 = vmax.bf16 %v2393_v60, %v1816_v46  ;;  %v2396_v3 = vcombine.low %v274_v61, %v290_v36  ;;  %v1877_v62 = vmax.bf16 %v2451_v39, %v1876_v40  ;;  %v3333_v39 = vld [vmem:[%s2970_s25 + $0x168] sm:$0xff] }
  0x87   : > { %v1857_v20 = vmax.bf16 %v2432_v4, %v1856_v49  ;;  %v2478_v60 = vcombine.low %v363_v41, %v379_v47  ;;  %v2398_v18 = vcombine.low %v275_v23, %v291_v7  ;;  %v2455_v50 = vcombine.high %v335_v6, %v351_v5  ;;  %v408_v6 = vld [vmem:[%s2970_s25 + $0x580] sm:$0xff] }
  0x88   : > { %v1796_v45 = vmax.bf16 %v2373_v21, %v1795_v37  ;;  %v1818_v48 = vmax.bf16 %v2394_v54, %v1817_v51  ;;  %v2397_v21 = vcombine.high %v274_v61, %v290_v36  ;;  %v1878_v26 = vmax.bf16 %v2452_v2, %v1877_v62  ;;  %v337_v61 = vld [vmem:[%s2970_s25 + $0x348] sm:$0xff]  ;;  %v392_v51 = vld [vmem:[%s2970_s25 + $0x500] sm:$0xff]  ;;  %v3359_v62 = vld [vmem:[%s2970_s25 + $0x350] sm:$0xff] }
  0x89   : > { %v1858_v4 = vmax.bf16 %v2433_v25, %v1857_v20  ;;  %v3647_v25 = vcombine.low %v3207_v9, %v3210_v13  ;;  %v2479_v58 = vcombine.high %v363_v41, %v379_v47  ;;  %v2399_v24 = vcombine.high %v275_v23, %v291_v7  ;;  %v353_v36 = vld [vmem:[%s2970_s25 + $0x3c8] sm:$0xff] }
  0x8a   : > { %v1797_v38 = vmax.bf16 %v2374_v15, %v1796_v45  ;;  %v1819_v52 = vmax.bf16 %v2395_v43, %v1818_v48  ;;  %v1903_v15 = vmax.bf16 %v2476_v63, %v1902_v14  ;;  %v1879_v1 = vmax.bf16 %v2453_v34, %v1878_v26  ;;  %v381_v2 = vld [vmem:[%s2970_s25 + $0x4a8] sm:$0xff] }
  0x8b   : > { %v1859_v54 = vmax.bf16 %v3647_v25, %v1858_v4  ;;  %v2400_v55 = vcombine.low %v3314_v44, %v3320_v31  ;;  %v2456_v46 = vcombine.low %v336_v53, %v352_v29  ;;  %v2480_v40 = vcombine.low %v364_v28, %v380_v35  ;;  %v393_v23 = vld [vmem:[%s2970_s25 + $0x508] sm:$0xff]  ;;  %v410_v25 = vld [vmem:[%s2970_s25 + $0x590] sm:$0xff] }
  0x8c   : > { %v1798_v42 = vmax.bf16 %v3646_v56, %v1797_v38  ;;  %v1820_v8 = vmax.bf16 %v2396_v3, %v1819_v52  ;;  %v1904_v59 = vmax.bf16 %v2477_v27, %v1903_v15  ;;  %v1880_v12 = vmax.bf16 %v2454_v30, %v1879_v1  ;;  %v409_v7 = vld [vmem:[%s2970_s25 + $0x588] sm:$0xff]  ;;  %v382_v30 = vld [vmem:[%s2970_s25 + $0x4b0] sm:$0xff] }
  0x8d   : > { %v1860_v37 = vmax.bf16 %v2435_v19, %v1859_v54  ;;  %v2401_v5 = vcombine.high %v3314_v44, %v3320_v31  ;;  %v2402_v63 = vcombine.low %v3333_v39, %v3336_v16  ;;  %v2457_v10 = vcombine.high %v336_v53, %v352_v29  ;;  %v354_v44 = vld [vmem:[%s2970_s25 + $0x3d0] sm:$0xff] }
  0x8e   : > { %1799 = vmax.xlane.bf16.xlu0 %v1798_v42  ;;  %v1821_v43 = vmax.bf16 %v2397_v21, %v1820_v8  ;;  %v1905_v49 = vmax.bf16 %v2478_v60, %v1904_v59  ;;  %v1881_v9 = vmax.bf16 %v2455_v50, %v1880_v12  ;;  %v3648_v13 = vcombine.low %v3215_v0, %v3223_v33  ;;  %v366_v21 = vld [vmem:[%s2970_s25 + $0x430] sm:$0xff]  ;;  %v367_v8 = vld [vmem:[%s2970_s25 + $0x438] sm:$0xff] }
  0x8f   : > { %v2481_v3 = vcombine.high %v364_v28, %v380_v35  ;;  %v2458_v41 = vcombine.low %v337_v61, %v353_v36  ;;  %v2482_v20 = vcombine.low %v3343_v11, %v381_v2  ;;  %v2504_v48 = vcombine.low %v392_v51, %v408_v6  ;;  %v294_v60 = vld [vmem:[%s2970_s25 + $0x1f0] sm:$0xff]  ;;  %v279_v12 = vld [vmem:[%s2970_s25 + $0x178] sm:$0xff] }
  0x90   : > { %v1861_v19 = vmax.bf16 %v3648_v13, %v1860_v37  ;;  %v1822_v45 = vmax.bf16 %v2398_v18, %v1821_v43  ;;  %v1906_v34 = vmax.bf16 %v2479_v58, %v1905_v49  ;;  %v1882_v47 = vmax.bf16 %v2456_v46, %v1881_v9  ;;  %v3379_v18 = vld [vmem:[%s2970_s25 + $0x358] sm:$0xff]  ;;  %v394_v35 = vld [vmem:[%s2970_s25 + $0x510] sm:$0xff]  ;;  %v356_v9 = vld [vmem:[%s2970_s25 + $0x3e0] sm:$0xff] }
  0x91   : > { %v3649_v27 = vcombine.high %v3215_v0, %v3223_v33  ;;  %v2505_v4 = vcombine.high %v392_v51, %v408_v6  ;;  %v2403_v31 = vcombine.high %v3333_v39, %v3336_v16  ;;  %v2459_v52 = vcombine.high %v337_v61, %v353_v36  ;;  %v278_v33 = vld [vmem:[%s2970_s25 + $0x170] sm:$0xff]  ;;  %v355_v16 = vld [vmem:[%s2970_s25 + $0x3d8] sm:$0xff]  ;;  %v368_v13 = vld [vmem:[%s2970_s25 + $0x440] sm:$0xff] }
  0x92   : > { %v1823_v38 = vmax.bf16 %v2399_v24, %v1822_v45  ;;  %v1907_v26 = vmax.bf16 %v2480_v40, %v1906_v34  ;;  %v1883_v53 = vmax.bf16 %v2457_v10, %v1882_v47  ;;  %v2483_v29 = vcombine.high %v3343_v11, %v381_v2  ;;  %v383_v58 = vld [vmem:[%s2970_s25 + $0x4b8] sm:$0xff]  ;;  %v3394_v2 = vld [vmem:[%s2970_s25 + $0x360] sm:$0xff] }
  0x93   : > { %v1862_v14 = vmax.bf16 %v3649_v27, %v1861_v19  ;;  %v2506_v42 = vcombine.low %v393_v23, %v409_v7  ;;  %v2460_v50 = vcombine.low %v3359_v62, %v354_v44  ;;  %v2484_v28 = vcombine.low %v366_v21, %v382_v30  ;;  %v395_v6 = vld [vmem:[%s2970_s25 + $0x518] sm:$0xff]  ;;  %v384_v19 = vld [vmem:[%s2970_s25 + $0x4c0] sm:$0xff] }
  0x94   : > { %v1824_v15 = vmax.bf16 %v2400_v55, %v1823_v38  ;;  %v1908_v56 = vmax.bf16 %v2481_v3, %v1907_v26  ;;  %v1884_v1 = vmax.bf16 %v2458_v41, %v1883_v53  ;;  %v2507_v54 = vcombine.high %v393_v23, %v409_v7  ;;  %v3404_v23 = vld [vmem:[%s2970_s25 + $0x368] sm:$0xff] }
  0x95   : > { %v1863_v0 = vmax.bf16 %v2438_v17, %v1862_v14  ;;  %v1933_v24 = vmax.bf16 %v2505_v4, %v2504_v48  ;;  %v2404_v55 = vcombine.low %v278_v33, %v294_v60  ;;  %v2461_v61 = vcombine.high %v3359_v62, %v354_v44  ;;  %v3407_v7 = vld [vmem:[%s2970_s25 + $0x3e8] sm:$0xff]  ;;  %v396_v4 = vld [vmem:[%s2970_s25 + $0x520] sm:$0xff] }
  0x96   : > { %v1825_v39 = vmax.bf16 %v2401_v5, %v1824_v15  ;;  %v1909_v59 = vmax.bf16 %v2482_v20, %v1908_v56  ;;  %v1885_v36 = vmax.bf16 %v2459_v52, %v1884_v1  ;;  %v2485_v46 = vcombine.high %v366_v21, %v382_v30  ;;  %v411_v5 = vld [vmem:[%s2970_s25 + $0x598] sm:$0xff]  ;;  %v3411_v30 = vld [vmem:[%s2970_s25 + $0x448] sm:$0xff]  ;;  %v440_v15 = vld [vmem:[%s2970_s25 + $0x680] sm:$0xff] }
  0x97   : > { %v1864_v17 = vmax.bf16 %v2439_v32, %v1863_v0  ;;  %v2508_v11 = vcombine.low %v394_v35, %v410_v25  ;;  %v1934_v37 = vmax.bf16 %v2506_v42, %v1933_v24  ;;  %v2405_v43 = vcombine.high %v278_v33, %v294_v60  ;;  %v385_v53 = vld [vmem:[%s2970_s25 + $0x4c8] sm:$0xff]  ;;  %v424_v60 = vld [vmem:[%s2970_s25 + $0x600] sm:$0xff] }
  0x98   : > { %v1826_v57 = vmax.bf16 %v2402_v63, %v1825_v39  ;;  %v1910_v32 = vmax.bf16 %v2483_v29, %v1909_v59  ;;  %v2462_v40 = vcombine.low %v3379_v18, %v355_v16  ;;  %v1886_v49 = vmax.bf16 %v2460_v50, %v1885_v36  ;;  %v425_v59 = vld [vmem:[%s2970_s25 + $0x608] sm:$0xff]  ;;  %v358_v36 = vld [vmem:[%s2970_s25 + $0x3f0] sm:$0xff] }
  0x99   : > { %1865 = vmax.xlane.bf16.xlu1 %v1864_v17  ;;  %v2486_v51 = vcombine.low %v367_v8, %v383_v58  ;;  %v2509_v63 = vcombine.high %v394_v35, %v410_v25  ;;  %v1935_v3 = vmax.bf16 %v2507_v54, %v1934_v37  ;;  %v2406_v34 = vcombine.low %v279_v12, %v295_v22  ;;  %v397_v25 = vld [vmem:[%s2970_s25 + $0x528] sm:$0xff] }
  0x9a   : > { %v1827_v10 = vmax.bf16 %v2403_v31, %v1826_v57  ;;  %v1911_v45 = vmax.bf16 %v2484_v28, %v1910_v32  ;;  %v2463_v62 = vcombine.high %v3379_v18, %v355_v16  ;;  %v1887_v41 = vmax.bf16 %v2461_v61, %v1886_v49  ;;  %v412_v31 = vld [vmem:[%s2970_s25 + $0x5a0] sm:$0xff]  ;;  %v3422_v28 = vld [vmem:[%s2970_s25 + $0x370] sm:$0xff]  ;;  %v441_v24 = vld [vmem:[%s2970_s25 + $0x688] sm:$0xff] }
  0x9b   : > { %v2487_v47 = vcombine.high %v367_v8, %v383_v58  ;;  %v2510_v27 = vcombine.low %v395_v6, %v411_v5  ;;  %v1936_v14 = vmax.bf16 %v2508_v11, %v1935_v3  ;;  %v2407_v38 = vcombine.high %v279_v12, %v295_v22  ;;  %v413_v8 = vld [vmem:[%s2970_s25 + $0x5a8] sm:$0xff]  ;;  %v386_v12 = vld [vmem:[%s2970_s25 + $0x4d0] sm:$0xff] }
  0x9c   : > { %v1828_v20 = vmax.bf16 %v2404_v55, %v1827_v10  ;;  %v1912_v48 = vmax.bf16 %v2485_v46, %v1911_v45  ;;  %v2464_v44 = vcombine.low %v3394_v2, %v356_v9  ;;  %v1888_v21 = vmax.bf16 %v2462_v40, %v1887_v41  ;;  %v370_v46 = vld [vmem:[%s2970_s25 + $0x450] sm:$0xff]  ;;  %v343_v10 = vld [vmem:[%s2970_s25 + $0x378] sm:$0xff] }
  0x9d   : > { %v2488_v26 = vcombine.low %v368_v13, %v384_v19  ;;  %v2511_v0 = vcombine.high %v395_v6, %v411_v5  ;;  %v1937_v33 = vmax.bf16 %v2509_v63, %v1936_v14  ;;  %v2465_v56 = vcombine.high %v3394_v2, %v356_v9  ;;  %v398_v40 = vld [vmem:[%s2970_s25 + $0x530] sm:$0xff]  ;;  %v387_v41 = vld [vmem:[%s2970_s25 + $0x4d8] sm:$0xff] }
  0x9e   : > { %v1829_v52 = vmax.bf16 %v2405_v43, %v1828_v20  ;;  %v1913_v29 = vmax.bf16 %v2486_v51, %v1912_v48  ;;  %v2466_v42 = vcombine.low %v3404_v23, %v3407_v7  ;;  %v1889_v18 = vmax.bf16 %v2463_v62, %v1888_v21  ;;  %v414_v49 = vld [vmem:[%s2970_s25 + $0x5b0] sm:$0xff]  ;;  %v371_v62 = vld [vmem:[%s2970_s25 + $0x458] sm:$0xff] }
  0x9f   : > { %v2489_v50 = vcombine.high %v368_v13, %v384_v19  ;;  %v2512_v54 = vcombine.low %v396_v4, %v412_v31  ;;  %v1938_v17 = vmax.bf16 %v2510_v27, %v1937_v33  ;;  %v2490_v16 = vcombine.low %v3411_v30, %v385_v53  ;;  %v426_v63 = vld [vmem:[%s2970_s25 + $0x610] sm:$0xff]  ;;  %v399_v21 = vld [vmem:[%s2970_s25 + $0x538] sm:$0xff] }
  0xa0   : > { %v1830_v1 = vmax.bf16 %v2406_v34, %v1829_v52  ;;  %v1914_v35 = vmax.bf16 %v2487_v47, %v1913_v29  ;;  %v1890_v39 = vmax.bf16 %v2464_v44, %v1889_v18  ;;  %v2513_v58 = vcombine.high %v396_v4, %v412_v31  ;;  %v442_v3 = vld [vmem:[%s2970_s25 + $0x690] sm:$0xff]  ;;  %v359_v34 = vld [vmem:[%s2970_s25 + $0x3f8] sm:$0xff] }
  0xa1   : > { %v2536_v55 = vcombine.low %v424_v60, %v440_v15  ;;  %v1939_v57 = vmax.bf16 %v2511_v0, %v1938_v17  ;;  %v2537_v32 = vcombine.high %v424_v60, %v440_v15  ;;  %v2467_v11 = vcombine.high %v3404_v23, %v3407_v7  ;;  %v427_v33 = vld [vmem:[%s2970_s25 + $0x618] sm:$0xff]  ;;  %v372_v15 = vld [vmem:[%s2970_s25 + $0x460] sm:$0xff] }
  0xa2   : > { %v1831_v61 = vmax.bf16 %v2407_v38, %v1830_v1  ;;  %v1915_v22 = vmax.bf16 %v2488_v26, %v1914_v35  ;;  %v1891_v37 = vmax.bf16 %v2465_v56, %v1890_v39  ;;  %v2491_v43 = vcombine.high %v3411_v30, %v385_v53  ;;  %v415_v30 = vld [vmem:[%s2970_s25 + $0x5b8] sm:$0xff]  ;;  %v388_v56 = vld [vmem:[%s2970_s25 + $0x4e0] sm:$0xff] }
  0xa3   : > { %v2514_v51 = vcombine.low %v397_v25, %v413_v8  ;;  %v1940_v6 = vmax.bf16 %v2512_v54, %v1939_v57  ;;  %v2538_v5 = vcombine.low %v425_v59, %v441_v24  ;;  %v2468_v9 = vcombine.low %v3422_v28, %v358_v36  ;;  %v443_v60 = vld [vmem:[%s2970_s25 + $0x698] sm:$0xff]  ;;  %v3452_v39 = vld [vmem:[%s2970_s25 + $0x540] sm:$0xff] }
  0xa4   : > { %1832 = vmax.xlane.bf16.xlu0 %v1831_v61  ;;  %v1916_v2 = vmax.bf16 %v2489_v50, %v1915_v22  ;;  %v1892_v13 = vmax.bf16 %v2466_v42, %v1891_v37  ;;  %v2492_v19 = vcombine.low %v370_v46, %v386_v12  ;;  %v2515_v45 = vcombine.high %v397_v25, %v413_v8  ;;  %v389_v22 = vld [vmem:[%s2970_s25 + $0x4e8] sm:$0xff] }
  0xa5   : > { %v1941_v20 = vmax.bf16 %v2513_v58, %v1940_v6  ;;  %v2539_v23 = vcombine.high %v425_v59, %v441_v24  ;;  %v1966_v7 = vmax.bf16 %v2537_v32, %v2536_v55  ;;  %v2469_v48 = vcombine.high %v3422_v28, %v358_v36  ;;  %v3456_v55 = vld [vmem:[%s2970_s25 + $0x468] sm:$0xff] }
  0xa6   : > { %v1917_v47 = vmax.bf16 %v2490_v16, %v1916_v2  ;;  %v1893_v27 = vmax.bf16 %v2467_v11, %v1892_v13  ;;  %v2493_v14 = vcombine.high %v370_v46, %v386_v12  ;;  %v2516_v38 = vcombine.low %v398_v40, %v414_v49  ;;  %v416_v16 = vld [vmem:[%s2970_s25 + $0x5c0] sm:$0xff] }
  0xa7   : > { %v1942_v26 = vmax.bf16 %v2514_v51, %v1941_v20  ;;  %v2540_v4 = vcombine.low %v426_v63, %v442_v3  ;;  %v1967_v31 = vmax.bf16 %v2538_v5, %v1966_v7  ;;  %v2470_v52 = vcombine.low %v343_v10, %v359_v34  ;;  %v428_v46 = vld [vmem:[%s2970_s25 + $0x620] sm:$0xff]  ;;  %v3464_v51 = vld [vmem:[%s2970_s25 + $0x548] sm:$0xff]  ;;  %v390_v7 = vld [vmem:[%s2970_s25 + $0x4f0] sm:$0xff] }
  0xa8   : > { %v1918_v44 = vmax.bf16 %v2491_v43, %v1917_v47  ;;  %v1894_v53 = vmax.bf16 %v2468_v9, %v1893_v27  ;;  %v2494_v29 = vcombine.low %v371_v62, %v387_v41  ;;  %v2517_v0 = vcombine.high %v398_v40, %v414_v49  ;;  %v444_v12 = vld [vmem:[%s2970_s25 + $0x6a0] sm:$0xff] }
  0xa9   : > { %v1943_v18 = vmax.bf16 %v2515_v45, %v1942_v26  ;;  %v2541_v50 = vcombine.high %v426_v63, %v442_v3  ;;  %v1968_v1 = vmax.bf16 %v2539_v23, %v1967_v31  ;;  %v2471_v28 = vcombine.high %v343_v10, %v359_v34  ;;  %v456_v43 = vld [vmem:[%s2970_s25 + $0x700] sm:$0xff]  ;;  %v417_v10 = vld [vmem:[%s2970_s25 + $0x5c8] sm:$0xff]  ;;  %v374_v23 = vld [vmem:[%s2970_s25 + $0x470] sm:$0xff] }
  0xaa   : > { %v1919_v42 = vmax.bf16 %v2492_v19, %v1918_v44  ;;  %v1895_v35 = vmax.bf16 %v2469_v48, %v1894_v53  ;;  %v2495_v25 = vcombine.high %v371_v62, %v387_v41  ;;  %v2518_v54 = vcombine.low %v399_v21, %v415_v30  ;;  %v472_v2 = vld [vmem:[%s2970_s25 + $0x780] sm:$0xff]  ;;  %v457_v45 = vld [vmem:[%s2970_s25 + $0x708] sm:$0xff]  ;;  %v418_v31 = vld [vmem:[%s2970_s25 + $0x5d0] sm:$0xff] }
  0xab   : > { %v1944_v8 = vmax.bf16 %v2516_v38, %v1943_v18  ;;  %v2542_v58 = vcombine.low %v427_v33, %v443_v60  ;;  %v1969_v59 = vmax.bf16 %v2540_v4, %v1968_v1  ;;  %v2496_v61 = vcombine.low %v372_v15, %v388_v56  ;;  %v473_v63 = vld [vmem:[%s2970_s25 + $0x788] sm:$0xff]  ;;  %v375_v1 = vld [vmem:[%s2970_s25 + $0x478] sm:$0xff] }
  0xac   : > { %v1920_v17 = vmax.bf16 %v2493_v14, %v1919_v42  ;;  %v1896_v24 = vmax.bf16 %v2470_v52, %v1895_v35  ;;  %v2519_v36 = vcombine.high %v399_v21, %v415_v30  ;;  %v2543_v11 = vcombine.high %v427_v33, %v443_v60  ;;  %v429_v62 = vld [vmem:[%s2970_s25 + $0x628] sm:$0xff]  ;;  %v3478_v21 = vld [vmem:[%s2970_s25 + $0x550] sm:$0xff] }
  0xad   : > { %v1945_v32 = vmax.bf16 %v2517_v0, %v1944_v8  ;;  %v1970_v37 = vmax.bf16 %v2541_v50, %v1969_v59  ;;  %v2497_v49 = vcombine.high %v372_v15, %v388_v56  ;;  %v2520_v6 = vcombine.low %v3452_v39, %v416_v16  ;;  %v445_v41 = vld [vmem:[%s2970_s25 + $0x6a8] sm:$0xff]  ;;  %v458_v0 = vld [vmem:[%s2970_s25 + $0x710] sm:$0xff] }
  0xae   : > { %v1921_v57 = vmax.bf16 %v2494_v29, %v1920_v17  ;;  %v1897_v40 = vmax.bf16 %v2471_v28, %v1896_v24  ;;  %v2544_v13 = vcombine.low %v428_v46, %v444_v12  ;;  %v2498_v3 = vcombine.low %v3456_v55, %v389_v22  ;;  %v474_v33 = vld [vmem:[%s2970_s25 + $0x790] sm:$0xff]  ;;  %v391_v28 = vld [vmem:[%s2970_s25 + $0x4f8] sm:$0xff] }
  0xaf   : > { %v1946_v9 = vmax.bf16 %v2518_v54, %v1945_v32  ;;  %v1971_v19 = vmax.bf16 %v2542_v58, %v1970_v37  ;;  %v2521_v34 = vcombine.high %v3452_v39, %v416_v16  ;;  %v2568_v47 = vcombine.low %v456_v43, %v472_v2  ;;  %v430_v56 = vld [vmem:[%s2970_s25 + $0x630] sm:$0xff]  ;;  %v403_v16 = vld [vmem:[%s2970_s25 + $0x558] sm:$0xff] }
  0xb0   : > { %v1922_v5 = vmax.bf16 %v2495_v25, %v1921_v57  ;;  %1898 = vmax.xlane.bf16.xlu1 %v1897_v40  ;;  %v2569_v20 = vcombine.high %v456_v43, %v472_v2  ;;  %v2545_v14 = vcombine.high %v428_v46, %v444_v12  ;;  %v2499_v44 = vcombine.high %v3456_v55, %v389_v22  ;;  %v446_v42 = vld [vmem:[%s2970_s25 + $0x6b0] sm:$0xff]  ;;  %v419_v55 = vld [vmem:[%s2970_s25 + $0x5d8] sm:$0xff] }
  0xb1   : > { %v1947_v27 = vmax.bf16 %v2519_v36, %v1946_v9  ;;  %v1972_v38 = vmax.bf16 %v2543_v11, %v1971_v19  ;;  %v2522_v30 = vcombine.low %v3464_v51, %v417_v10  ;;  %v2570_v26 = vcombine.low %v457_v45, %v473_v63  ;;  %v459_v12 = vld [vmem:[%s2970_s25 + $0x718] sm:$0xff] }
  0xb2   : > { %v1923_v48 = vmax.bf16 %v2496_v61, %v1922_v5  ;;  %v2546_v53 = vcombine.low %v429_v62, %v445_v41  ;;  %v2500_v60 = vcombine.low %v374_v23, %v390_v7  ;;  %v2523_v15 = vcombine.high %v3464_v51, %v417_v10  ;;  %v475_v22 = vld [vmem:[%s2970_s25 + $0x798] sm:$0xff]  ;;  %v404_v10 = vld [vmem:[%s2970_s25 + $0x560] sm:$0xff] }
  0xb3   : > { %v1948_v52 = vmax.bf16 %v2520_v6, %v1947_v27  ;;  %v1973_v29 = vmax.bf16 %v2544_v13, %v1972_v38  ;;  %v2571_v18 = vcombine.high %v457_v45, %v473_v63  ;;  %v1999_v50 = vmax.bf16 %v2569_v20, %v2568_v47  ;;  %v431_v11 = vld [vmem:[%s2970_s25 + $0x638] sm:$0xff]  ;;  %v420_v63 = vld [vmem:[%s2970_s25 + $0x5e0] sm:$0xff] }
  0xb4   : > { %v1924_v4 = vmax.bf16 %v2497_v49, %v1923_v48  ;;  %v2547_v54 = vcombine.high %v429_v62, %v445_v41  ;;  %v2501_v39 = vcombine.high %v374_v23, %v390_v7  ;;  %v2524_v8 = vcombine.low %v3478_v21, %v418_v31  ;;  %v447_v37 = vld [vmem:[%s2970_s25 + $0x6b8] sm:$0xff]  ;;  %v460_v41 = vld [vmem:[%s2970_s25 + $0x720] sm:$0xff] }
  0xb5   : > { %v1949_v25 = vmax.bf16 %v2521_v34, %v1948_v52  ;;  %v1974_v17 = vmax.bf16 %v2545_v14, %v1973_v29  ;;  %v2572_v58 = vcombine.low %v458_v0, %v474_v33  ;;  %v2000_v59 = vmax.bf16 %v2570_v26, %v1999_v50  ;;  %v476_v47 = vld [vmem:[%s2970_s25 + $0x7a0] sm:$0xff]  ;;  %v405_v52 = vld [vmem:[%s2970_s25 + $0x568] sm:$0xff] }
  0xb6   : > { %v1925_v35 = vmax.bf16 %v2498_v3, %v1924_v4  ;;  %v2548_v36 = vcombine.low %v430_v56, %v446_v42  ;;  %v2502_v57 = vcombine.low %v375_v1, %v391_v28  ;;  %v2525_v32 = vcombine.high %v3478_v21, %v418_v31  ;;  %v432_v23 = vld [vmem:[%s2970_s25 + $0x640] sm:$0xff] }
  0xb7   : > { %v1950_v61 = vmax.bf16 %v2522_v30, %v1949_v25  ;;  %v1975_v46 = vmax.bf16 %v2546_v53, %v1974_v17  ;;  %v2573_v43 = vcombine.high %v458_v0, %v474_v33  ;;  %v2001_v2 = vmax.bf16 %v2571_v18, %v2000_v59  ;;  %v448_v7 = vld [vmem:[%s2970_s25 + $0x6c0] sm:$0xff]  ;;  %v461_v33 = vld [vmem:[%s2970_s25 + $0x728] sm:$0xff] }
  0xb8   : > { %v1926_v24 = vmax.bf16 %v2499_v44, %v1925_v35  ;;  %v2549_v51 = vcombine.high %v430_v56, %v446_v42  ;;  %v2503_v5 = vcombine.high %v375_v1, %v391_v28  ;;  %v2526_v9 = vcombine.low %v403_v16, %v419_v55  ;;  %v433_v56 = vld [vmem:[%s2970_s25 + $0x648] sm:$0xff] }
  0xb9   : > { %v1951_v49 = vmax.bf16 %v2523_v15, %v1950_v61  ;;  %v1976_v6 = vmax.bf16 %v2547_v54, %v1975_v46  ;;  %v2574_v13 = vcombine.low %v459_v12, %v475_v22  ;;  %v2002_v19 = vmax.bf16 %v2572_v58, %v2001_v2  ;;  %v421_v15 = vld [vmem:[%s2970_s25 + $0x5e8] sm:$0xff]  ;;  %v422_v61 = vld [vmem:[%s2970_s25 + $0x5f0] sm:$0xff] }
  0xba   : > { %v1927_v40 = vmax.bf16 %v2500_v60, %v1926_v24  ;;  %v2550_v34 = vcombine.low %v431_v11, %v447_v37  ;;  %v2527_v20 = vcombine.high %v403_v16, %v419_v55  ;;  %v2575_v48 = vcombine.high %v459_v12, %v475_v22  ;;  %v477_v60 = vld [vmem:[%s2970_s25 + $0x7a8] sm:$0xff]  ;;  %v462_v24 = vld [vmem:[%s2970_s25 + $0x730] sm:$0xff] }
  0xbb   : > { %v1952_v3 = vmax.bf16 %v2524_v8, %v1951_v49  ;;  %v1977_v62 = vmax.bf16 %v2548_v36, %v1976_v6  ;;  %v2003_v27 = vmax.bf16 %v2573_v43, %v2002_v19  ;;  %v2551_v44 = vcombine.high %v431_v11, %v447_v37  ;;  %v449_v42 = vld [vmem:[%s2970_s25 + $0x6c8] sm:$0xff]  ;;  %v478_v55 = vld [vmem:[%s2970_s25 + $0x7b0] sm:$0xff]  ;;  %v435_v19 = vld [vmem:[%s2970_s25 + $0x658] sm:$0xff] }
  0xbc   : > { %v1928_v45 = vmax.bf16 %v2501_v39, %v1927_v40  ;;  %v2528_v30 = vcombine.low %v404_v10, %v420_v63  ;;  %v2576_v26 = vcombine.low %v460_v41, %v476_v47  ;;  %v2552_v29 = vcombine.low %v432_v23, %v448_v7  ;;  %v406_v39 = vld [vmem:[%s2970_s25 + $0x570] sm:$0xff]  ;;  %v407_v40 = vld [vmem:[%s2970_s25 + $0x578] sm:$0xff] }
  0xbd   : > { %v1953_v38 = vmax.bf16 %v2525_v32, %v1952_v3  ;;  %v1978_v21 = vmax.bf16 %v2549_v51, %v1977_v62  ;;  %v2004_v4 = vmax.bf16 %v2574_v13, %v2003_v27  ;;  %v2577_v18 = vcombine.high %v460_v41, %v476_v47  ;;  %v434_v36 = vld [vmem:[%s2970_s25 + $0x650] sm:$0xff]  ;;  %v423_v13 = vld [vmem:[%s2970_s25 + $0x5f8] sm:$0xff] }
  0xbe   : > { %v1929_v14 = vmax.bf16 %v2502_v57, %v1928_v45  ;;  %v2529_v1 = vcombine.high %v404_v10, %v420_v63  ;;  %v2553_v35 = vcombine.high %v432_v23, %v448_v7  ;;  %v2578_v54 = vcombine.low %v461_v33, %v477_v60  ;;  %v450_v46 = vld [vmem:[%s2970_s25 + $0x6d0] sm:$0xff]  ;;  %v463_v10 = vld [vmem:[%s2970_s25 + $0x738] sm:$0xff] }
  0xbf   : > { %v1954_v53 = vmax.bf16 %v2526_v9, %v1953_v38  ;;  %v1979_v0 = vmax.bf16 %v2550_v34, %v1978_v21  ;;  %v2005_v50 = vmax.bf16 %v2575_v48, %v2004_v4  ;;  %v2530_v16 = vcombine.low %v405_v52, %v421_v15  ;;  %v479_v9 = vld [vmem:[%s2970_s25 + $0x7b8] sm:$0xff]  ;;  %v464_v38 = vld [vmem:[%s2970_s25 + $0x740] sm:$0xff] }
  0xc0   : > { %v1930_v31 = vmax.bf16 %v2503_v5, %v1929_v14  ;;  %v2554_v58 = vcombine.low %v433_v56, %v449_v42  ;;  %v2579_v12 = vcombine.high %v461_v33, %v477_v60  ;;  %v2531_v57 = vcombine.high %v405_v52, %v421_v15  ;;  %v451_v45 = vld [vmem:[%s2970_s25 + $0x6d8] sm:$0xff]  ;;  %v436_v21 = vld [vmem:[%s2970_s25 + $0x660] sm:$0xff] }
  0xc1   : > { %v1955_v28 = vmax.bf16 %v2527_v20, %v1954_v53  ;;  %v1980_v25 = vmax.bf16 %v2551_v44, %v1979_v0  ;;  %v2006_v17 = vmax.bf16 %v2576_v26, %v2005_v50  ;;  %v2555_v11 = vcombine.high %v433_v56, %v449_v42  ;;  %v480_v44 = vld [vmem:[%s2970_s25 + $0x7c0] sm:$0xff]  ;;  %v465_v42 = vld [vmem:[%s2970_s25 + $0x748] sm:$0xff] }
  0xc2   : > { %1931 = vmax.xlane.bf16.xlu0 %v1930_v31  ;;  %v2580_v43 = vcombine.low %v462_v24, %v478_v55  ;;  %v2532_v49 = vcombine.low %v406_v39, %v422_v61  ;;  %v2556_v6 = vcombine.low %v434_v36, %v450_v46  ;;  %v2581_v63 = vcombine.high %v462_v24, %v478_v55  ;;  %v437_v50 = vld [vmem:[%s2970_s25 + $0x668] sm:$0xff]  ;;  %v482_v24 = vld [vmem:[%s2970_s25 + $0x7d0] sm:$0xff] }
  0xc3   : > { %v1956_v8 = vmax.bf16 %v2528_v30, %v1955_v28  ;;  %v1981_v59 = vmax.bf16 %v2552_v29, %v1980_v25  ;;  %v2007_v22 = vmax.bf16 %v2577_v18, %v2006_v17  ;;  %v2533_v34 = vcombine.high %v406_v39, %v422_v61  ;;  %v452_v30 = vld [vmem:[%s2970_s25 + $0x6e0] sm:$0xff]  ;;  %v481_v18 = vld [vmem:[%s2970_s25 + $0x7c8] sm:$0xff]  ;;  %v438_v55 = vld [vmem:[%s2970_s25 + $0x670] sm:$0xff] }
  0xc4   : > { %v2557_v41 = vcombine.high %v434_v36, %v450_v46  ;;  %v2582_v20 = vcombine.low %v463_v10, %v479_v9  ;;  %v2534_v7 = vcombine.low %v407_v40, %v423_v13  ;;  %v2558_v27 = vcombine.low %v435_v19, %v451_v45  ;;  %v454_v61 = vld [vmem:[%s2970_s25 + $0x6f0] sm:$0xff] }
  0xc5   : > { %v1957_v32 = vmax.bf16 %v2529_v1, %v1956_v8  ;;  %v1982_v37 = vmax.bf16 %v2553_v35, %v1981_v59  ;;  %v2008_v2 = vmax.bf16 %v2578_v54, %v2007_v22  ;;  %v2583_v26 = vcombine.high %v463_v10, %v479_v9  ;;  %v453_v1 = vld [vmem:[%s2970_s25 + $0x6e8] sm:$0xff]  ;;  %v466_v59 = vld [vmem:[%s2970_s25 + $0x750] sm:$0xff] }
  0xc6   : > { %v2535_v31 = vcombine.high %v407_v40, %v423_v13  ;;  %v2559_v53 = vcombine.high %v435_v19, %v451_v45  ;;  %v2584_v0 = vcombine.low %v464_v38, %v480_v44  ;;  %v2560_v15 = vcombine.low %v436_v21, %v452_v30  ;;  %v439_v40 = vld [vmem:[%s2970_s25 + $0x678] sm:$0xff] }
  0xc7   : > { %v1958_v51 = vmax.bf16 %v2530_v16, %v1957_v32  ;;  %v1983_v5 = vmax.bf16 %v2554_v58, %v1982_v37  ;;  %v2009_v3 = vmax.bf16 %v2579_v12, %v2008_v2  ;;  %v2585_v28 = vcombine.high %v464_v38, %v480_v44  ;;  %v483_v2 = vld [vmem:[%s2970_s25 + $0x7d8] sm:$0xff] }
  0xc8   : > { %v2561_v54 = vcombine.high %v436_v21, %v452_v30  ;;  %v2586_v39 = vcombine.low %v465_v42, %v481_v18  ;;  %v2562_v8 = vcombine.low %v437_v50, %v453_v1  ;;  %v2587_v36 = vcombine.high %v465_v42, %v481_v18 }
  0xc9   : > { %v1959_v62 = vmax.bf16 %v2531_v57, %v1958_v51  ;;  %v1984_v47 = vmax.bf16 %v2555_v11, %v1983_v5  ;;  %v2010_v23 = vmax.bf16 %v2580_v43, %v2009_v3  ;;  %v2563_v12 = vcombine.high %v437_v50, %v453_v1  ;;  %v467_v43 = vld [vmem:[%s2970_s25 + $0x758] sm:$0xff]  ;;  %v484_v3 = vld [vmem:[%s2970_s25 + $0x7e0] sm:$0xff] }
  0xca   : > { %v2588_v57 = vcombine.low %v466_v59, %v482_v24  ;;  %v2564_v11 = vcombine.low %v438_v55, %v454_v61  ;;  %v2589_v51 = vcombine.high %v466_v59, %v482_v24  ;;  %v2565_v5 = vcombine.high %v438_v55, %v454_v61 }
  0xcb   : > { %v1960_v48 = vmax.bf16 %v2532_v49, %v1959_v62  ;;  %v1985_v14 = vmax.bf16 %v2556_v6, %v1984_v47  ;;  %v2011_v4 = vmax.bf16 %v2581_v63, %v2010_v23  ;;  %v455_v49 = vld [vmem:[%s2970_s25 + $0x6f8] sm:$0xff]  ;;  %v2590_v9 = vcombine.low %v467_v43, %v483_v2  ;;  %v468_v63 = vld [vmem:[%s2970_s25 + $0x760] sm:$0xff] }
  0xcc   : > { %v2566_v19 = vcombine.low %v439_v40, %v455_v49 }
  0xcd   : > { %v1961_v52 = vmax.bf16 %v2533_v34, %v1960_v48  ;;  %v1986_v29 = vmax.bf16 %v2557_v41, %v1985_v14  ;;  %v2012_v33 = vmax.bf16 %v2582_v20, %v2011_v4  ;;  %v2591_v34 = vcombine.high %v467_v43, %v483_v2  ;;  %v469_v48 = vld [vmem:[%s2970_s25 + $0x768] sm:$0xff]  ;;  %v486_v4 = vld [vmem:[%s2970_s25 + $0x7f0] sm:$0xff] }
  0xce   : > { %v2567_v41 = vcombine.high %v439_v40, %v455_v49  ;;  %v2592_v20 = vcombine.low %v468_v63, %v484_v3  ;;  %v2593_v14 = vcombine.high %v468_v63, %v484_v3 }
  0xcf   : > { %v1962_v60 = vmax.bf16 %v2534_v7, %v1961_v52  ;;  %v1987_v56 = vmax.bf16 %v2558_v27, %v1986_v29  ;;  %v2013_v35 = vmax.bf16 %v2583_v26, %v2012_v33  ;;  %v485_v27 = vld [vmem:[%s2970_s25 + $0x7e8] sm:$0xff]  ;;  %v470_v26 = vld [vmem:[%s2970_s25 + $0x770] sm:$0xff]  ;;  %v487_v33 = vld [vmem:[%s2970_s25 + $0x7f8] sm:$0xff] }
  0xd0   : > { %v2594_v21 = vcombine.low %v469_v48, %v485_v27 }
  0xd1   : > { %v1963_v25 = vmax.bf16 %v2535_v31, %v1962_v60  ;;  %v1988_v17 = vmax.bf16 %v2559_v53, %v1987_v56  ;;  %v2014_v16 = vmax.bf16 %v2584_v0, %v2013_v35  ;;  %v2595_v31 = vcombine.high %v469_v48, %v485_v27  ;;  %v471_v0 = vld [vmem:[%s2970_s25 + $0x778] sm:$0xff] }
  0xd2   : > { %v2596_v53 = vcombine.low %v470_v26, %v486_v4  ;;  %v2597_v60 = vcombine.high %v470_v26, %v486_v4  ;;  %v2598_v56 = vcombine.low %v471_v0, %v487_v33  ;;  %v2599_v18 = vcombine.high %v471_v0, %v487_v33 }
  0xd3   : > { %1964 = vmax.xlane.bf16.xlu1 %v1963_v25  ;;  %v1989_v58 = vmax.bf16 %v2560_v15, %v1988_v17  ;;  %v2015_v46 = vmax.bf16 %v2585_v28, %v2014_v16  ;;  %v2064_v35 = vlaneseq }
  0xd5   : > { %v1990_v22 = vmax.bf16 %v2561_v54, %v1989_v58  ;;  %v2016_v32 = vmax.bf16 %v2586_v39, %v2015_v46  ;;  %v3545_v25 = vand.u32 127, %v2064_v35  ;;  %v3547_v17 = vshrl.u32 %v2064_v35, 7 }
  0xd7   : > { %v1991_v37 = vmax.bf16 %v2562_v8, %v1990_v22  ;;  %v2017_v6 = vmax.bf16 %v2587_v36, %v2016_v32  ;;  %v2070_v39 = vadd.s32 4294967288, %v3545_v25  ;;  %v2077_v16 = vadd.s32 4294967280, %v3545_v25 }
  0xd8   : > { %v2068_v58 = vsub.s32 %v3545_v25, %v3547_v17  ;;  %v2084_v61 = vadd.s32 4294967272, %v3545_v25  ;;  %v2098_v40 = vadd.s32 4294967256, %v3545_v25  ;;  %v2119_v3 = vadd.s32 4294967232, %v3545_v25 }
  0xd9   : > { %v1992_v10 = vmax.bf16 %v2563_v12, %v1991_v37  ;;  %v2018_v13 = vmax.bf16 %v2588_v57, %v2017_v6  ;;  %v2073_v59 = vsub.s32 %v2070_v39, %v3547_v17  ;;  %v2080_v36 = vsub.s32 %v2077_v16, %v3547_v17 }
  0xda   : > { %v2087_v57 = vsub.s32 %v2084_v61, %v3547_v17  ;;  %v2122_v48 = vsub.s32 %v2119_v3, %v3547_v17  ;;  %v2140_v0 = vadd.s32 4294967208, %v3545_v25  ;;  %v2154_v35 = vadd.s32 4294967192, %v3545_v25 }
  0xdb   : > { %v1993_v45 = vmax.bf16 %v2564_v11, %v1992_v10  ;;  %v2019_v62 = vmax.bf16 %v2589_v51, %v2018_v13  ;;  %v2091_v11 = vadd.s32 4294967264, %v3545_v25  ;;  %v2105_v10 = vadd.s32 4294967248, %v3545_v25 }
  0xdd   : > { %v1994_v47 = vmax.bf16 %v2565_v5, %v1993_v45  ;;  %v2020_v23 = vmax.bf16 %v2590_v9, %v2019_v62  ;;  %v2094_v51 = vsub.s32 %v2091_v11, %v3547_v17  ;;  %v2101_v9 = vsub.s32 %v2098_v40, %v3547_v17 }
  0xdf   : > { %v1995_v7 = vmax.bf16 %v2566_v19, %v1994_v47  ;;  %v2021_v38 = vmax.bf16 %v2591_v34, %v2020_v23  ;;  %v2112_v34 = vadd.s32 4294967240, %v3545_v25  ;;  %v2108_v47 = vsub.s32 %v2105_v10, %v3547_v17 }
  0xe1   : > { %v1996_v44 = vmax.bf16 %v2567_v41, %v1995_v7  ;;  %v2022_v30 = vmax.bf16 %v2592_v20, %v2021_v38  ;;  %v2126_v7 = vadd.s32 4294967224, %v3545_v25 }
  0xe3   : > { %1997 = vmax.xlane.bf16.xlu0 %v1996_v44  ;;  %v2023_v52 = vmax.bf16 %v2593_v14, %v2022_v30  ;;  %v2115_v14 = vsub.s32 %v2112_v34, %v3547_v17  ;;  %v2133_v30 = vadd.s32 4294967216, %v3545_v25  ;;  %v2129_v26 = vsub.s32 %v2126_v7, %v3547_v17 }
  0xe5   : > { %v2024_v29 = vmax.bf16 %v2594_v21, %v2023_v52  ;;  %v2136_v33 = vsub.s32 %v2133_v30, %v3547_v17 }
  0xe7   : > { %v2025_v15 = vmax.bf16 %v2595_v31, %v2024_v29 }
  0xe9   : > { %v2026_v42 = vmax.bf16 %v2596_v53, %v2025_v15  ;;  %v2147_v15 = vadd.s32 4294967200, %v3545_v25 }
  0xeb   : > { %v2027_v50 = vmax.bf16 %v2597_v60, %v2026_v42  ;;  %v2150_v39 = vsub.s32 %v2147_v15, %v3547_v17 }
  0xed   : > { %v2028_v1 = vmax.bf16 %v2598_v56, %v2027_v50 }
  0xef   : > { %v2029_v28 = vmax.bf16 %v2599_v18, %v2028_v1  ;;  %v2143_v1 = vsub.s32 %v2140_v0, %v3547_v17 }
  0xf1   : > { %2030 = vmax.xlane.bf16.xlu1 %v2029_v28 }
 0x11b   : > { %v1800_v54 = vpop.xlane.xlu0 %1799 }
 0x11c   : > { %v2032_v24 = vunpack.c.l.bf16 %v1800_v54  ;;  %v2033_v55 = vunpack.c.h.bf16 %v1800_v54 }
 0x11e   : > { %v2069_v12 = vrot.slane %v2032_v24, %v2068_v58  ;;  %v2074_v22 = vrot.slane %v2033_v55, %v2073_v59  ;;  %v2157_v59 = vsub.s32 %v2154_v35, %v3547_v17 }
 0x120   : > { %v2076_v2 = vsel %vm2075_vm15, %v2074_v22, %v2069_v12 }
 0x126   : > { %v1866_v43 = vpop.xlane.xlu1 %1865 }
 0x127   : > { %v2036_v6 = vunpack.c.l.bf16 %v1866_v43  ;;  %v2037_v13 = vunpack.c.h.bf16 %v1866_v43 }
 0x129   : > { %v2095_v63 = vrot.slane %v2036_v6, %v2094_v51  ;;  %v2102_v23 = vrot.slane %v2037_v13, %v2101_v9 }
 0x131   : > { %v1833_v8 = vpop.xlane.xlu0 %1832 }
 0x132   : > { %v2034_v46 = vunpack.c.l.bf16 %v1833_v8  ;;  %v2035_v32 = vunpack.c.h.bf16 %v1833_v8 }
 0x134   : > { %v2081_v37 = vrot.slane %v2034_v46, %v2080_v36  ;;  %v2088_v49 = vrot.slane %v2035_v32, %v2087_v57  ;;  %v2161_v36 = vadd.s32 4294967184, %v3545_v25  ;;  %v2168_v46 = vadd.s32 4294967176, %v3545_v25 }
 0x136   : > { %v2083_v5 = vsel %vm2082_vm0, %v2081_v37, %v2076_v2  ;;  %v2164_v32 = vsub.s32 %v2161_v36, %v3547_v17  ;;  %v2171_v11 = vsub.s32 %v2168_v46, %v3547_v17 }
 0x137   : > { %v2090_v19 = vsel %vm2089_vm1, %v2088_v49, %v2083_v5 }
 0x138   : > { %v2097_v41 = vsel %vm2096_vm2, %v2095_v63, %v2090_v19 }
 0x139   : > { %v2104_v44 = vsel %vm2103_vm4, %v2102_v23, %v2097_v41 }
 0x13d   : > { %v1899_v45 = vpop.xlane.xlu1 %1898 }
 0x13e   : > { %v2038_v20 = vunpack.c.l.bf16 %v1899_v45  ;;  %v2039_v38 = vunpack.c.h.bf16 %v1899_v45 }
 0x140   : > { %v2109_v21 = vrot.slane %v2038_v20, %v2108_v47  ;;  %v2116_v29 = vrot.slane %v2039_v38, %v2115_v14 }
 0x142   : > { %v2111_v52 = vsel %vm2110_vm3, %v2109_v21, %v2104_v44 }
 0x143   : > { %v2118_v56 = vsel %vm2117_vm7, %v2116_v29, %v2111_v52 }
 0x14f   : > { %v1932_v62 = vpop.xlane.xlu0 %1931 }
 0x150   : > { %v2040_v27 = vunpack.c.l.bf16 %v1932_v62  ;;  %v2041_v4 = vunpack.c.h.bf16 %v1932_v62 }
 0x152   : > { %v2123_v53 = vrot.slane %v2040_v27, %v2122_v48  ;;  %v2130_v42 = vrot.slane %v2041_v4, %v2129_v26 }
 0x154   : > { %v2125_v50 = vsel %vm2124_vm5, %v2123_v53, %v2118_v56 }
 0x155   : > { %v2132_v8 = vsel %vm2131_vm6, %v2130_v42, %v2125_v50 }
 0x160   : > { %v1965_v31 = vpop.xlane.xlu1 %1964 }
 0x161   : > { %v2042_v60 = vunpack.c.l.bf16 %v1965_v31  ;;  %v2043_v28 = vunpack.c.h.bf16 %v1965_v31 }
 0x163   : > { %v2137_v54 = vrot.slane %v2042_v60, %v2136_v33  ;;  %v2144_v58 = vrot.slane %v2043_v28, %v2143_v1 }
 0x165   : > { %v2139_v55 = vsel %vm2138_vm8, %v2137_v54, %v2132_v8 }
 0x166   : > { %v2146_v12 = vsel %vm2145_vm9, %v2144_v58, %v2139_v55 }
 0x170   : > { %v1998_v18 = vpop.xlane.xlu0 %1997 }
 0x171   : > { %v2044_v16 = vunpack.c.l.bf16 %v1998_v18  ;;  %v2045_v24 = vunpack.c.h.bf16 %v1998_v18 }
 0x173   : > { %v2151_v61 = vrot.slane %v2044_v16, %v2150_v39  ;;  %v2158_v22 = vrot.slane %v2045_v24, %v2157_v59 }
 0x175   : > { %v2153_v57 = vsel %vm2152_vm10, %v2151_v61, %v2146_v12 }
 0x176   : > { %v2160_v40 = vsel %vm2159_vm11, %v2158_v22, %v2153_v57 }
 0x17e   : > { %v2031_v37 = vpop.xlane.xlu1 %2030 }
 0x17f   : > { %v2046_v43 = vunpack.c.l.bf16 %v2031_v37  ;;  %v2047_v2 = vunpack.c.h.bf16 %v2031_v37 }
 0x181   : > { %v2165_v25 = vrot.slane %v2046_v43, %v2164_v32  ;;  %v2172_v49 = vrot.slane %v2047_v2, %v2171_v11 }
 0x183   : > { %v2167_v51 = vsel %vm2166_vm12, %v2165_v25, %v2160_v40 }
 0x184   : > { %v2174_v17 = vsel %vm2173_vm13, %v2172_v49, %v2167_v51 }
 0x185   : > { %2176 = vst [vmem:[%s214_s16] sm:$0x1] %v2174_v17 }
 0x186   : > { %2730 = shalt.err (!%p2727_p3)
}
 0x187   : > { %s2731_s8 = scalar_lea.hbm %s3586_s15, 16  ;;  %s2735_s5 = scalar_lea.hbm %s3633_s3, 160 }
 0x188   : > { %p2732_p4 = scmp.ne.s32.totalorder %s3586_s15, %s2731_s8  ;;  %p2736_p5 = scmp.lt.s32.totalorder %s3586_s15, %s3633_s3 }
 0x189   : > { %p2737_p11 = scmp.lt.s32.totalorder %s2735_s5, %s2731_s8 }
 0x18a   : > { %p2733_p8 = pnand %p2732_p4, %p3650_p6 }
 0x18b   : > { %p2738_p0 = por %p2737_p11, %p2736_p5 }
 0x18c   : > { %p2734_p7 = pneg %p2733_p8 }
 0x18e   : > { %p2739_p1 = pnand %p2738_p0, %p2734_p7 }
 0x190   : > { %2742 = shalt.err (!%p2739_p1)
}
 0x191   : > { %2608 = dma.vmem_to_hbm [thread:$0]  (%p3650_p6), %s2230_s17, 16, %s3586_s15, %s2213_s27  }
 0x192 PF: > { %p2621_p9 = scmp.ge.s32.totalorder %s2807_s0, 2  ;;  %s2244_s14 = sand.u32 1, %s2783_s18  }
 0x193   : > { %p3651_p10 = scmp.ne.s32.totalorder %s3641_s12, 0  ;;  %s2245_s16 = scalar_lea.sflag [#allocation6], %s2244_s14 }
 0x195   : > { %p2617_p12 = pnand %p2621_p9, %p3651_p10 }
 0x197   : > { %p2618_p13 = pneg %p2617_p12 }
 0x199   : > { %2778 = dma.done.wait (%p2618_p13), %s2245_s16, 16  }
 0x19a   : > { %2780 = vsyncadd (%p2618_p13), %s2245_s16, 4294967280  ;;  %s3652_s11 = sld [smem:[#allocation13_spill]]  ;;  %p22_p6 = scmp.ge.s32.totalorder %s2880_s26, 12  }
 0x19b   : > { %s3653_s18 = smov %s2787_s19  ;;  %s3654_s19 = smov %s2791_s20 }
 0x19c   : > { %s3655_s20 = smov %s2907_s9  ;;  %s3656_s21 = smov %s2799_s22 }
 0x19d   : > { %s3657_s22 = smov %s2803_s23  ;;  %s3659_s0 = smov %s2880_s26 }
 0x19e   :  { %24 = sbr.rel (!%p22_p6) target bundleno = 12 (0xc), region = 88 }
 0x1a0   : > { %s3658_s23 = smov %s3652_s11 }
 0x1a3   :  { %2256 = vsyncpa [#allocation5], 1 }
 0x1a4   :  { %2258 = vsyncpa [#allocation5 + $0x1], 1 }
 0x1a5   :  { %2259 = vsyncpa [#allocation6], 1 }
 0x1a6   :  { %2261 = vsyncpa [#allocation6 + $0x1], 1 }

</bundles_post_ra>
